<compile_context>
chip_gen: v7x
topology: tpu7x:2x2x1
jax: 0.10.0
libtpu: 0.0.40
codegen_flags: <defaults>
</compile_context>

<pallas_src>
import jax
import jax.numpy as jnp
from jax.experimental import pallas as pl
from jax.experimental.pallas import tpu as pltpu

EPS = 1e-5                       # nn.BatchNorm2d default eps
LANE = 128                       # lane width / channel padding granularity
VMEM_LIMIT = 48 * 1024 * 1024    # leaves headroom inside v7x's 64 MiB VMEM
EW_ROWS = 4096                   # large row tile for the elementwise kernel

_TAPS = [(kh, kw) for kh in range(3) for kw in range(3)]


# ----------------------------- Pallas kernels ------------------------------

def _write_stats(st_ref, acc):
    # Per-channel (sum, sum_sq) partials for this image, computed in f32
    # BEFORE the bf16 cast of the conv output.  st block is (1, 2, Cp).
    st_ref[0, 0:1, :] = jnp.sum(acc, axis=0, keepdims=True)
    st_ref[0, 1:2, :] = jnp.sum(acc * acc, axis=0, keepdims=True)


def _conv_taps(src, w_ref, ho, wo, cin):
    # 3x3 conv as 9 shifted matmuls (bf16 operands, f32 accumulation).
    # `src(kh, kw)` yields the (ho, wo, cin) input window of one tap.
    acc = None
    for t, (kh, kw) in enumerate(_TAPS):
        patch = src(kh, kw).reshape(ho * wo, cin)
        part = jnp.dot(patch, w_ref[t * cin:(t + 1) * cin, :],
                       preferred_element_type=jnp.float32)
        acc = part if acc is None else acc + part
    return acc                                          # (ho*wo, Cp) f32


def _make_conv1_kernel(s, hq, ho, wo, cin, cp, with_proj):
    # Input block is the phase-split / zero-padded image: (1, s*s*hq, wq, cin),
    # where row block [p*s+q] holds xpad[p::s, q::s].  Tap (kh, kw) of the
    # 3x3/stride-s conv reads phase (kh%s, kw%s) at offset (kh//s, kw//s).
    def tap_window(xph_ref, kh, kw):
        ph = (kh % s) * s + (kw % s)
        return xph_ref[0, pl.ds(ph * hq + kh // s, ho),
                       pl.ds(kw // s, wo), :]

    def body(xph_ref, w1_ref, ws_ref, y1_ref, ysc_ref, st1_ref, sts_ref):
        acc = _conv_taps(lambda kh, kw: tap_window(xph_ref, kh, kw),
                         w1_ref, ho, wo, cin)
        _write_stats(st1_ref, acc)
        y1_ref[0] = acc.reshape(ho, wo, cp).astype(y1_ref.dtype)
        if with_proj:
            # 1x1/stride-s projection shortcut: x[s*oh, s*ow] = xpad[s*oh+1,
            # s*ow+1] lives in phase (1%s, 1%s) at offset 1//s.
            ph = (1 % s) * s + (1 % s)
            psc = xph_ref[0, pl.ds(ph * hq + 1 // s, ho),
                          pl.ds(1 // s, wo), :].reshape(ho * wo, cin)
            accs = jnp.dot(psc, ws_ref[...],
                           preferred_element_type=jnp.float32)
            _write_stats(sts_ref, accs)
            ysc_ref[0] = accs.reshape(ho, wo, cp).astype(ysc_ref.dtype)

    if with_proj:
        return body
    return lambda xph_ref, w1_ref, y1_ref, st1_ref: body(
        xph_ref, w1_ref, None, y1_ref, None, st1_ref, None)


def _make_conv2_kernel(ho, wo, cp):
    def kernel(y1_ref, s1_ref, t1_ref, w2_ref, y2_ref, st2_ref, apad_ref):
        # BN1 + ReLU fused into conv2's input path (no act1 HBM round trip).
        act = jnp.maximum(
            y1_ref[0].astype(jnp.float32) * s1_ref[0] + t1_ref[0], 0.0)
        apad_ref[...] = jnp.zeros_like(apad_ref)           # zero halo border
        apad_ref[pl.ds(1, ho), pl.ds(1, wo), :] = act.astype(apad_ref.dtype)
        acc = _conv_taps(
            lambda kh, kw: apad_ref[pl.ds(kh, ho), pl.ds(kw, wo), :],
            w2_ref, ho, wo, cp)
        _write_stats(st2_ref, acc)
        y2_ref[0] = acc.reshape(ho, wo, cp).astype(y2_ref.dtype)
    return kernel


def _fuse_kernel(y2_ref, sc_ref, s2_ref, t2_ref, ss_ref, ts_ref, o_ref):
    # BN2 on the residual branch, BN_s (or identity: scale=1, shift=0) on the
    # shortcut, residual add, final ReLU.  y2/shortcut arrive in bf16/f32.
    res = y2_ref[...].astype(jnp.float32) * s2_ref[...] + t2_ref[...]
    sc = sc_ref[...].astype(jnp.float32) * ss_ref[...] + ts_ref[...]
    o_ref[...] = jnp.maximum(res + sc, 0.0)


# --------------------------- pallas_call wrappers ---------------------------

def _row_spec(tm, width):
    return pl.BlockSpec((tm, width), lambda i: (i, 0))


def _resident_spec(shape):
    # Invariant operand: same block every grid step -> stays VMEM-resident.
    # TODO(synk): pipeline_mode=pl.Buffered(1) here would single-buffer the
    # resident weights and free ~half their VMEM footprint on v7x (64 MiB).
    return pl.BlockSpec(shape, lambda i: (0, 0))


def _cparams():
    return pltpu.CompilerParams(dimension_semantics=("parallel",),
                                vmem_limit_bytes=VMEM_LIMIT)


def _conv1_call(xph, w1p, s, hq, ho, wo, cp, wsp=None):
    n, rows, wq, cin = xph.shape
    with_proj = wsp is not None
    kern = _make_conv1_kernel(s, hq, ho, wo, cin, cp, with_proj)
    img_spec = pl.BlockSpec((1, rows, wq, cin), lambda i: (i, 0, 0, 0))
    y_spec = pl.BlockSpec((1, ho, wo, cp), lambda i: (i, 0, 0, 0))
    st_spec = pl.BlockSpec((1, 2, cp), lambda i: (i, 0, 0))
    y_shape = jax.ShapeDtypeStruct((n, ho, wo, cp), jnp.bfloat16)
    st_shape = jax.ShapeDtypeStruct((n, 2, cp), jnp.float32)
    flops = 2 * n * ho * wo * 9 * cin * cp
    byt = 2 * xph.size + 2 * w1p.size + 2 * n * ho * wo * cp + 4 * n * 2 * cp
    if with_proj:
        flops += 2 * n * ho * wo * cin * cp
        byt += 2 * wsp.size + 2 * n * ho * wo * cp + 4 * n * 2 * cp
        return pl.pallas_call(
            kern, grid=(n,),
            in_specs=[img_spec, _resident_spec((9 * cin, cp)),
                      _resident_spec((cin, cp))],
            out_specs=[y_spec, y_spec, st_spec, st_spec],
            out_shape=[y_shape, y_shape, st_shape, st_shape],
            compiler_params=_cparams(),
            cost_estimate=pl.CostEstimate(flops=flops, transcendentals=0,
                                          bytes_accessed=byt),
        )(xph, w1p, wsp)
    return pl.pallas_call(
        kern, grid=(n,),
        in_specs=[img_spec, _resident_spec((9 * cin, cp))],
        out_specs=[y_spec, st_spec],
        out_shape=[y_shape, st_shape],
        compiler_params=_cparams(),
        cost_estimate=pl.CostEstimate(flops=flops, transcendentals=0,
                                      bytes_accessed=byt),
    )(xph, w1p)


def _conv2_call(y1, s1, t1, w2p, ho, wo, cp):
    n = y1.shape[0]
    kern = _make_conv2_kernel(ho, wo, cp)
    y_spec = pl.BlockSpec((1, ho, wo, cp), lambda i: (i, 0, 0, 0))
    st_spec = pl.BlockSpec((1, 2, cp), lambda i: (i, 0, 0))
    flops = 2 * n * ho * wo * 9 * cp * cp
    byt = (2 * y1.size + 2 * w2p.size + 2 * n * ho * wo * cp
           + 4 * n * 2 * cp + 8 * cp)
    return pl.pallas_call(
        kern, grid=(n,),
        in_specs=[y_spec, _resident_spec((1, cp)), _resident_spec((1, cp)),
                  _resident_spec((9 * cp, cp))],
        out_specs=[y_spec, st_spec],
        out_shape=[jax.ShapeDtypeStruct((n, ho, wo, cp), jnp.bfloat16),
                   jax.ShapeDtypeStruct((n, 2, cp), jnp.float32)],
        scratch_shapes=[pltpu.VMEM((ho + 2, wo + 2, cp), jnp.bfloat16)],
        compiler_params=_cparams(),
        cost_estimate=pl.CostEstimate(flops=flops, transcendentals=0,
                                      bytes_accessed=byt),
    )(y1, s1, t1, w2p)


def _pick_ew_rows(m, target=EW_ROWS):
    # Large decoupled row tile for the purely elementwise kernel: prefer an
    # exact multiple-of-8 divisor of m, otherwise rely on pl.cdiv and a
    # partial final block (never a single whole-array tile for awkward m).
    if m <= target:
        return m
    for d in range(target, 7, -8):
        if m % d == 0:
            return d
    return target


def _fuse_call(y2f, scf, s2, t2, ss, ts):
    m, cp = y2f.shape
    tm = _pick_ew_rows(m)
    return pl.pallas_call(
        _fuse_kernel, grid=(pl.cdiv(m, tm),),
        in_specs=[_row_spec(tm, cp), _row_spec(tm, cp),
                  _resident_spec((1, cp)), _resident_spec((1, cp)),
                  _resident_spec((1, cp)), _resident_spec((1, cp))],
        out_specs=_row_spec(tm, cp),
        out_shape=jax.ShapeDtypeStruct((m, cp), jnp.float32),
        compiler_params=_cparams(),
    )(y2f, scf, s2, t2, ss, ts)


# ------------------------------- JAX glue -----------------------------------

def _round_up(v, mult):
    return ((v + mult - 1) // mult) * mult


def _pad_cols(a, cp):
    return jnp.pad(a, ((0, 0), (0, cp - a.shape[-1])))


def _build_conv1_input(x_f32, s):
    """Zero-pad x spatially by 1, phase-split by stride, cast to bf16.

    Returns (xph, hq): xph has shape (N, s*s*hq, wq, C); row block [p*s+q]
    holds xpad[:, p::s, q::s, :].  This single small staging pass replaces
    the former 9x im2col through HBM and keeps every in-kernel tap window
    a contiguous slice (no strided VMEM access, even at stride 2).
    """
    n, h, w, c = x_f32.shape
    xp = jnp.pad(x_f32, ((0, 0), (1, 1), (1, 1), (0, 0))).astype(jnp.bfloat16)
    if s == 1:
        return xp, h + 2
    assert h % s == 0 and w % s == 0, "spatial dims must be divisible by stride"
    hq, wq = (h + 2) // s, (w + 2) // s
    phases = [xp[:, p::s, q::s, :] for p in range(s) for q in range(s)]
    xph = jnp.stack(phases, axis=1).reshape(n, s * s * hq, wq, c)
    return xph, hq


def _finalize_bn(st, gamma, beta, count):
    # Reduce per-image (sum, sum_sq) partials and fold BatchNorm
    # (training-mode, biased variance, eps=1e-5) into per-channel scale/shift.
    total = jnp.sum(st[:, 0, :], axis=0)
    total_sq = jnp.sum(st[:, 1, :], axis=0)
    mean = total / count
    var = jnp.maximum(total_sq / count - mean * mean, 0.0)
    scale = gamma[0] * jax.lax.rsqrt(var + EPS)
    shift = beta[0] - mean * scale
    return scale[None, :], shift[None, :]                 # (1, Cp) each


def init_basic_block_params(key, in_planes, out_planes):
    ks = jax.random.split(key, 7)
    # conv weights in HWIO layout (kh, kw, cin, cout); BN gamma/beta per channel
    w1 = 0.1 * jax.random.normal(ks[0], (3, 3, in_planes, out_planes), jnp.float32)
    w2 = 0.1 * jax.random.normal(ks[1], (3, 3, out_planes, out_planes), jnp.float32)
    ws = 0.1 * jax.random.normal(ks[2], (1, 1, in_planes, out_planes), jnp.float32)
    g1 = 1.0 + 0.1 * jax.random.normal(ks[3], (out_planes,), jnp.float32)
    b1 = 0.1 * jax.random.normal(ks[4], (out_planes,), jnp.float32)
    g2 = 1.0 + 0.1 * jax.random.normal(ks[5], (out_planes,), jnp.float32)
    b2 = 0.1 * jax.random.normal(ks[6], (out_planes,), jnp.float32)
    gs = jnp.ones((out_planes,), jnp.float32)
    bs = jnp.zeros((out_planes,), jnp.float32)
    return dict(w1=w1, w2=w2, ws=ws, g1=g1, b1=b1, g2=g2, b2=b2, gs=gs, bs=bs)


def basic_block_forward(x_nchw, params, stride):
    x = jnp.transpose(x_nchw, (0, 2, 3, 1)).astype(jnp.float32)      # NHWC f32
    n, h, w, cin = x.shape
    cout = params["w1"].shape[-1]
    cp = _round_up(cout, LANE)                                       # lane-dense
    s = int(stride)
    ho = (h - 1) // s + 1
    wo = (w - 1) // s + 1
    m = n * ho * wo

    # Weights reshaped to (taps*Cin, Cp) bf16; BN gamma/beta zero-padded to Cp.
    w1p = _pad_cols(params["w1"].reshape(9 * cin, cout), cp).astype(jnp.bfloat16)
    w2p = jnp.pad(params["w2"],
                  ((0, 0), (0, 0), (0, cp - cout), (0, cp - cout))
                  ).reshape(9 * cp, cp).astype(jnp.bfloat16)
    g1 = _pad_cols(params["g1"][None, :], cp)
    b1 = _pad_cols(params["b1"][None, :], cp)
    g2 = _pad_cols(params["g2"][None, :], cp)
    b2 = _pad_cols(params["b2"][None, :], cp)

    xph, hq = _build_conv1_input(x, s)

    # ---- stage 1: conv3x3/stride (+ fused 1x1 projection shortcut) ----
    use_proj = (s != 1) or (cin != cout)
    if use_proj:
        wsp = _pad_cols(params["ws"].reshape(cin, cout), cp).astype(jnp.bfloat16)
        y1, ysc, st1, sts = _conv1_call(xph, w1p, s, hq, ho, wo, cp, wsp=wsp)
        gs = _pad_cols(params["gs"][None, :], cp)
        bs = _pad_cols(params["bs"][None, :], cp)
        ss, ts = _finalize_bn(sts, gs, bs, float(m))
        scf = ysc.reshape(m, cp)
    else:
        y1, st1 = _conv1_call(xph, w1p, s, hq, ho, wo, cp)
        # Identity shortcut: raw x (f32), lane-padded to Cp, unit BN.
        # TODO(synk): read x directly in the fuse kernel (in-kernel lane pad)
        # to drop this staging pass over the shortcut tensor.
        scf = _pad_cols(x.reshape(m, cin), cp)
        ss = jnp.ones((1, cp), jnp.float32)
        ts = jnp.zeros((1, cp), jnp.float32)

    # ---- stage 2: conv3x3/1 with BN1+ReLU fused into its input path ----
    s1, t1 = _finalize_bn(st1, g1, b1, float(m))
    y2, st2 = _conv2_call(y1, s1, t1, w2p, ho, wo, cp)
    s2, t2 = _finalize_bn(st2, g2, b2, float(m))

    # ---- BN2 + shortcut BN (or identity) + add + final ReLU ----
    out = _fuse_call(y2.reshape(m, cp), scf, s2, t2, ss, ts)

    out = out[:, :cout].reshape(n, ho, wo, cout)
    return jnp.transpose(out, (0, 3, 1, 2))                          # NCHW


# --------------------------- pure-JAX reference -----------------------------
# Matches the original module's math: conv (bias-free), training-mode
# BatchNorm (biased variance, eps=1e-5), ReLU, projection/identity shortcut.
# Conv operands are bf16 with f32 accumulation, like the kernel's MXU path.

def _ref_conv(x, w, stride, pad):
    return jax.lax.conv_general_dilated(
        x.astype(jnp.bfloat16), w.astype(jnp.bfloat16),
        (stride, stride), [(pad, pad), (pad, pad)],
        dimension_numbers=("NHWC", "HWIO", "NHWC"),
        preferred_element_type=jnp.float32)


def _ref_bn(y, g, b):
    mean = jnp.mean(y, axis=(0, 1, 2), keepdims=True)
    var = jnp.mean(jnp.square(y - mean), axis=(0, 1, 2), keepdims=True)
    return (y - mean) * jax.lax.rsqrt(var + EPS) * g + b


def basic_block_reference(x_nchw, params, stride):
    x = jnp.transpose(x_nchw, (0, 2, 3, 1)).astype(jnp.float32)
    cin = x.shape[-1]
    cout = params["w1"].shape[-1]
    y = jax.nn.relu(_ref_bn(_ref_conv(x, params["w1"], stride, 1),
                            params["g1"], params["b1"]))
    res = _ref_bn(_ref_conv(y, params["w2"], 1, 1), params["g2"], params["b2"])
    if stride != 1 or cin != cout:
        sc = _ref_bn(_ref_conv(x, params["ws"], stride, 0),
                     params["gs"], params["bs"])
    else:
        sc = x
    out = jax.nn.relu(res + sc)
    return jnp.transpose(out, (0, 3, 1, 2))


# --------------------------------- main -------------------------------------

if __name__ == "__main__":
    key = jax.random.PRNGKey(0)
    k_x, k_p, k_x2, k_p2 = jax.random.split(key, 4)

    # Tolerance note: the kernels store conv intermediates (y1/ysc/y2) in
    # bf16 (BN stats are still f32) while the reference keeps them in f32;
    # for unit-scale BN outputs this bounds the worst element error at a few
    # 1e-2, so we allow 6e-2 max-abs (~1.5% of the output range).
    TOL = 6e-2

    # --- projection-shortcut configuration (stride 2, channel change) ---
    N, in_planes, H, W = 2, 4, 16, 16
    out_planes, stride = 8, 2
    x = jax.random.normal(k_x, (N, in_planes, H, W), jnp.float32)    # NCHW
    params = init_basic_block_params(k_p, in_planes, out_planes)
    out = jax.block_until_ready(basic_block_forward(x, params, stride))
    ref = jax.block_until_ready(basic_block_reference(x, params, stride))
    assert out.shape == (N, out_planes, H // stride, W // stride), out.shape
    err = float(jnp.max(jnp.abs(out - ref)))
    assert err < TOL, err

    # --- identity-shortcut configuration (stride 1, same channels) ---
    x2 = jax.random.normal(k_x2, (N, out_planes, H, W), jnp.float32)
    params2 = init_basic_block_params(k_p2, out_planes, out_planes)
    out2 = jax.block_until_ready(basic_block_forward(x2, params2, 1))
    ref2 = jax.block_until_ready(basic_block_reference(x2, params2, 1))
    assert out2.shape == (N, out_planes, H, W), out2.shape
    err2 = float(jnp.max(jnp.abs(out2 - ref2)))
    assert err2 < TOL, err2

    print("KERNEL_OK")
</pallas_src>

<mosaic_0001>
module attributes {stable_mosaic.version = 11 : i64} {
  func.func @body(%arg0: i32, %arg1: memref<1x36x9x4xbf16, #tpu.memory_space<vmem>>, %arg2: memref<36x128xbf16, #tpu.memory_space<vmem>>, %arg3: memref<4x128xbf16, #tpu.memory_space<vmem>>, %arg4: memref<1x8x8x128xbf16, #tpu.memory_space<vmem>>, %arg5: memref<1x8x8x128xbf16, #tpu.memory_space<vmem>>, %arg6: memref<1x2x128xf32, #tpu.memory_space<vmem>>, %arg7: memref<1x2x128xf32, #tpu.memory_space<vmem>>) attributes {dimension_semantics = [#tpu.dimension_semantics<parallel>], iteration_bounds = array<i64: 2>, scalar_prefetch = 0 : i64, scratch_operands = 0 : i64, tpu.core_type = #tpu.core_type<tc>, window_params = [{transform_indices = @transform_0, window_bounds = array<i64: 1, 36, 9, 4>}, {pipeline_mode = #tpu.pipeline_mode<synchronous>, transform_indices = @transform_1, window_bounds = array<i64: 36, 128>}, {pipeline_mode = #tpu.pipeline_mode<synchronous>, transform_indices = @transform_2, window_bounds = array<i64: 4, 128>}, {transform_indices = @transform_3, window_bounds = array<i64: 1, 8, 8, 128>}, {transform_indices = @transform_4, window_bounds = array<i64: 1, 8, 8, 128>}, {transform_indices = @transform_5, window_bounds = array<i64: 1, 2, 128>}, {transform_indices = @transform_6, window_bounds = array<i64: 1, 2, 128>}]} {
    %c0 = arith.constant 0 : index
    %c0_0 = arith.constant 0 : index
    %c0_1 = arith.constant 0 : index
    %c0_2 = arith.constant 0 : index
    %0 = vector.load %arg1[%c0, %c0_0, %c0_1, %c0_2] : memref<1x36x9x4xbf16, #tpu.memory_space<vmem>>, vector<1x8x8x4xbf16>
    %1 = vector.shape_cast %0 : vector<1x8x8x4xbf16> to vector<8x8x4xbf16>
    %2 = vector.shape_cast %1 : vector<8x8x4xbf16> to vector<64x4xbf16>
    %c0_3 = arith.constant 0 : index
    %c0_4 = arith.constant 0 : index
    %3 = vector.load %arg2[%c0_3, %c0_4] : memref<36x128xbf16, #tpu.memory_space<vmem>>, vector<4x128xbf16>
    %cst = arith.constant dense<0.000000e+00> : vector<64x128xf32>
    %4 = tpu.matmul %2, %3, %cst {dimension_numbers = #tpu.dot_dimension_numbers<[1], [0], [0], [1], [0, 0, 1, 1], [], []>} : vector<64x4xbf16>, vector<4x128xbf16>, vector<64x128xf32> -> vector<64x128xf32>
    %c0_5 = arith.constant 0 : index
    %c9 = arith.constant 9 : index
    %c0_6 = arith.constant 0 : index
    %c0_7 = arith.constant 0 : index
    %5 = vector.load %arg1[%c0_5, %c9, %c0_6, %c0_7] : memref<1x36x9x4xbf16, #tpu.memory_space<vmem>>, vector<1x8x8x4xbf16>
    %6 = vector.shape_cast %5 : vector<1x8x8x4xbf16> to vector<8x8x4xbf16>
    %7 = vector.shape_cast %6 : vector<8x8x4xbf16> to vector<64x4xbf16>
    %c4 = arith.constant 4 : index
    %c0_8 = arith.constant 0 : index
    %8 = vector.load %arg2[%c4, %c0_8] : memref<36x128xbf16, #tpu.memory_space<vmem>>, vector<4x128xbf16>
    %cst_9 = arith.constant dense<0.000000e+00> : vector<64x128xf32>
    %9 = tpu.matmul %7, %8, %cst_9 {dimension_numbers = #tpu.dot_dimension_numbers<[1], [0], [0], [1], [0, 0, 1, 1], [], []>} : vector<64x4xbf16>, vector<4x128xbf16>, vector<64x128xf32> -> vector<64x128xf32>
    %10 = arith.addf %4, %9 : vector<64x128xf32>
    %c0_10 = arith.constant 0 : index
    %c0_11 = arith.constant 0 : index
    %c1 = arith.constant 1 : index
    %c0_12 = arith.constant 0 : index
    %11 = vector.load %arg1[%c0_10, %c0_11, %c1, %c0_12] : memref<1x36x9x4xbf16, #tpu.memory_space<vmem>>, vector<1x8x8x4xbf16>
    %12 = vector.shape_cast %11 : vector<1x8x8x4xbf16> to vector<8x8x4xbf16>
    %13 = vector.shape_cast %12 : vector<8x8x4xbf16> to vector<64x4xbf16>
    %c8 = arith.constant 8 : index
    %c0_13 = arith.constant 0 : index
    %14 = vector.load %arg2[%c8, %c0_13] : memref<36x128xbf16, #tpu.memory_space<vmem>>, vector<4x128xbf16>
    %cst_14 = arith.constant dense<0.000000e+00> : vector<64x128xf32>
    %15 = tpu.matmul %13, %14, %cst_14 {dimension_numbers = #tpu.dot_dimension_numbers<[1], [0], [0], [1], [0, 0, 1, 1], [], []>} : vector<64x4xbf16>, vector<4x128xbf16>, vector<64x128xf32> -> vector<64x128xf32>
    %16 = arith.addf %10, %15 : vector<64x128xf32>
    %c0_15 = arith.constant 0 : index
    %c18 = arith.constant 18 : index
    %c0_16 = arith.constant 0 : index
    %c0_17 = arith.constant 0 : index
    %17 = vector.load %arg1[%c0_15, %c18, %c0_16, %c0_17] : memref<1x36x9x4xbf16, #tpu.memory_space<vmem>>, vector<1x8x8x4xbf16>
    %18 = vector.shape_cast %17 : vector<1x8x8x4xbf16> to vector<8x8x4xbf16>
    %19 = vector.shape_cast %18 : vector<8x8x4xbf16> to vector<64x4xbf16>
    %c12 = arith.constant 12 : index
    %c0_18 = arith.constant 0 : index
    %20 = vector.load %arg2[%c12, %c0_18] : memref<36x128xbf16, #tpu.memory_space<vmem>>, vector<4x128xbf16>
    %cst_19 = arith.constant dense<0.000000e+00> : vector<64x128xf32>
    %21 = tpu.matmul %19, %20, %cst_19 {dimension_numbers = #tpu.dot_dimension_numbers<[1], [0], [0], [1], [0, 0, 1, 1], [], []>} : vector<64x4xbf16>, vector<4x128xbf16>, vector<64x128xf32> -> vector<64x128xf32>
    %22 = arith.addf %16, %21 : vector<64x128xf32>
    %c0_20 = arith.constant 0 : index
    %c27 = arith.constant 27 : index
    %c0_21 = arith.constant 0 : index
    %c0_22 = arith.constant 0 : index
    %23 = vector.load %arg1[%c0_20, %c27, %c0_21, %c0_22] : memref<1x36x9x4xbf16, #tpu.memory_space<vmem>>, vector<1x8x8x4xbf16>
    %24 = vector.shape_cast %23 : vector<1x8x8x4xbf16> to vector<8x8x4xbf16>
    %25 = vector.shape_cast %24 : vector<8x8x4xbf16> to vector<64x4xbf16>
    %c16 = arith.constant 16 : index
    %c0_23 = arith.constant 0 : index
    %26 = vector.load %arg2[%c16, %c0_23] : memref<36x128xbf16, #tpu.memory_space<vmem>>, vector<4x128xbf16>
    %cst_24 = arith.constant dense<0.000000e+00> : vector<64x128xf32>
    %27 = tpu.matmul %25, %26, %cst_24 {dimension_numbers = #tpu.dot_dimension_numbers<[1], [0], [0], [1], [0, 0, 1, 1], [], []>} : vector<64x4xbf16>, vector<4x128xbf16>, vector<64x128xf32> -> vector<64x128xf32>
    %28 = arith.addf %22, %27 : vector<64x128xf32>
    %c0_25 = arith.constant 0 : index
    %c18_26 = arith.constant 18 : index
    %c1_27 = arith.constant 1 : index
    %c0_28 = arith.constant 0 : index
    %29 = vector.load %arg1[%c0_25, %c18_26, %c1_27, %c0_28] : memref<1x36x9x4xbf16, #tpu.memory_space<vmem>>, vector<1x8x8x4xbf16>
    %30 = vector.shape_cast %29 : vector<1x8x8x4xbf16> to vector<8x8x4xbf16>
    %31 = vector.shape_cast %30 : vector<8x8x4xbf16> to vector<64x4xbf16>
    %c20 = arith.constant 20 : index
    %c0_29 = arith.constant 0 : index
    %32 = vector.load %arg2[%c20, %c0_29] : memref<36x128xbf16, #tpu.memory_space<vmem>>, vector<4x128xbf16>
    %cst_30 = arith.constant dense<0.000000e+00> : vector<64x128xf32>
    %33 = tpu.matmul %31, %32, %cst_30 {dimension_numbers = #tpu.dot_dimension_numbers<[1], [0], [0], [1], [0, 0, 1, 1], [], []>} : vector<64x4xbf16>, vector<4x128xbf16>, vector<64x128xf32> -> vector<64x128xf32>
    %34 = arith.addf %28, %33 : vector<64x128xf32>
    %c0_31 = arith.constant 0 : index
    %c1_32 = arith.constant 1 : index
    %c0_33 = arith.constant 0 : index
    %c0_34 = arith.constant 0 : index
    %35 = vector.load %arg1[%c0_31, %c1_32, %c0_33, %c0_34] : memref<1x36x9x4xbf16, #tpu.memory_space<vmem>>, vector<1x8x8x4xbf16>
    %36 = vector.shape_cast %35 : vector<1x8x8x4xbf16> to vector<8x8x4xbf16>
    %37 = vector.shape_cast %36 : vector<8x8x4xbf16> to vector<64x4xbf16>
    %c24 = arith.constant 24 : index
    %c0_35 = arith.constant 0 : index
    %38 = vector.load %arg2[%c24, %c0_35] : memref<36x128xbf16, #tpu.memory_space<vmem>>, vector<4x128xbf16>
    %cst_36 = arith.constant dense<0.000000e+00> : vector<64x128xf32>
    %39 = tpu.matmul %37, %38, %cst_36 {dimension_numbers = #tpu.dot_dimension_numbers<[1], [0], [0], [1], [0, 0, 1, 1], [], []>} : vector<64x4xbf16>, vector<4x128xbf16>, vector<64x128xf32> -> vector<64x128xf32>
    %40 = arith.addf %34, %39 : vector<64x128xf32>
    %c0_37 = arith.constant 0 : index
    %c10 = arith.constant 10 : index
    %c0_38 = arith.constant 0 : index
    %c0_39 = arith.constant 0 : index
    %41 = vector.load %arg1[%c0_37, %c10, %c0_38, %c0_39] : memref<1x36x9x4xbf16, #tpu.memory_space<vmem>>, vector<1x8x8x4xbf16>
    %42 = vector.shape_cast %41 : vector<1x8x8x4xbf16> to vector<8x8x4xbf16>
    %43 = vector.shape_cast %42 : vector<8x8x4xbf16> to vector<64x4xbf16>
    %c28 = arith.constant 28 : index
    %c0_40 = arith.constant 0 : index
    %44 = vector.load %arg2[%c28, %c0_40] : memref<36x128xbf16, #tpu.memory_space<vmem>>, vector<4x128xbf16>
    %cst_41 = arith.constant dense<0.000000e+00> : vector<64x128xf32>
    %45 = tpu.matmul %43, %44, %cst_41 {dimension_numbers = #tpu.dot_dimension_numbers<[1], [0], [0], [1], [0, 0, 1, 1], [], []>} : vector<64x4xbf16>, vector<4x128xbf16>, vector<64x128xf32> -> vector<64x128xf32>
    %46 = arith.addf %40, %45 : vector<64x128xf32>
    %c0_42 = arith.constant 0 : index
    %c1_43 = arith.constant 1 : index
    %c1_44 = arith.constant 1 : index
    %c0_45 = arith.constant 0 : index
    %47 = vector.load %arg1[%c0_42, %c1_43, %c1_44, %c0_45] : memref<1x36x9x4xbf16, #tpu.memory_space<vmem>>, vector<1x8x8x4xbf16>
    %48 = vector.shape_cast %47 : vector<1x8x8x4xbf16> to vector<8x8x4xbf16>
    %49 = vector.shape_cast %48 : vector<8x8x4xbf16> to vector<64x4xbf16>
    %c32 = arith.constant 32 : index
    %c0_46 = arith.constant 0 : index
    %50 = vector.load %arg2[%c32, %c0_46] : memref<36x128xbf16, #tpu.memory_space<vmem>>, vector<4x128xbf16>
    %cst_47 = arith.constant dense<0.000000e+00> : vector<64x128xf32>
    %51 = tpu.matmul %49, %50, %cst_47 {dimension_numbers = #tpu.dot_dimension_numbers<[1], [0], [0], [1], [0, 0, 1, 1], [], []>} : vector<64x4xbf16>, vector<4x128xbf16>, vector<64x128xf32> -> vector<64x128xf32>
    %52 = arith.addf %46, %51 : vector<64x128xf32>
    %cst_48 = arith.constant dense<0.000000e+00> : vector<128xf32>
    %53 = vector.multi_reduction <add>, %52, %cst_48 [0] : vector<64x128xf32> to vector<128xf32>
    %54 = vector.shape_cast %53 : vector<128xf32> to vector<1x128xf32>
    %c0_49 = arith.constant 0 : index
    %c0_50 = arith.constant 0 : index
    %c0_51 = arith.constant 0 : index
    %55 = vector.load %arg6[%c0_49, %c0_50, %c0_51] : memref<1x2x128xf32, #tpu.memory_space<vmem>>, vector<1x1x128xf32>
    %56 = vector.shape_cast %55 : vector<1x1x128xf32> to vector<1x128xf32>
    %57 = vector.shape_cast %54 : vector<1x128xf32> to vector<1x1x128xf32>
    tpu.vector_store %arg6[%c0_49, %c0_50, %c0_51], %57 {strides = array<i32>} : memref<1x2x128xf32, #tpu.memory_space<vmem>>, vector<1x1x128xf32>,
    %58 = arith.mulf %52, %52 : vector<64x128xf32>
    %cst_52 = arith.constant dense<0.000000e+00> : vector<128xf32>
    %59 = vector.multi_reduction <add>, %58, %cst_52 [0] : vector<64x128xf32> to vector<128xf32>
    %60 = vector.shape_cast %59 : vector<128xf32> to vector<1x128xf32>
    %c0_53 = arith.constant 0 : index
    %c1_54 = arith.constant 1 : index
    %c0_55 = arith.constant 0 : index
    %61 = vector.load %arg6[%c0_53, %c1_54, %c0_55] : memref<1x2x128xf32, #tpu.memory_space<vmem>>, vector<1x1x128xf32>
    %62 = vector.shape_cast %61 : vector<1x1x128xf32> to vector<1x128xf32>
    %63 = vector.shape_cast %60 : vector<1x128xf32> to vector<1x1x128xf32>
    tpu.vector_store %arg6[%c0_53, %c1_54, %c0_55], %63 {strides = array<i32>} : memref<1x2x128xf32, #tpu.memory_space<vmem>>, vector<1x1x128xf32>,
    %64 = vector.shape_cast %52 : vector<64x128xf32> to vector<8x8x128xf32>
    %65 = arith.truncf %64 : vector<8x8x128xf32> to vector<8x8x128xbf16>
    %c0_56 = arith.constant 0 : index
    %c0_57 = arith.constant 0 : index
    %c0_58 = arith.constant 0 : index
    %c0_59 = arith.constant 0 : index
    %66 = vector.load %arg4[%c0_56, %c0_57, %c0_58, %c0_59] : memref<1x8x8x128xbf16, #tpu.memory_space<vmem>>, vector<1x8x8x128xbf16>
    %67 = vector.shape_cast %66 : vector<1x8x8x128xbf16> to vector<8x8x128xbf16>
    %68 = vector.shape_cast %65 : vector<8x8x128xbf16> to vector<1x8x8x128xbf16>
    tpu.vector_store %arg4[%c0_56, %c0_57, %c0_58, %c0_59], %68 {strides = array<i32>} : memref<1x8x8x128xbf16, #tpu.memory_space<vmem>>, vector<1x8x8x128xbf16>,
    %c0_60 = arith.constant 0 : index
    %c27_61 = arith.constant 27 : index
    %c0_62 = arith.constant 0 : index
    %c0_63 = arith.constant 0 : index
    %69 = vector.load %arg1[%c0_60, %c27_61, %c0_62, %c0_63] : memref<1x36x9x4xbf16, #tpu.memory_space<vmem>>, vector<1x8x8x4xbf16>
    %70 = vector.shape_cast %69 : vector<1x8x8x4xbf16> to vector<8x8x4xbf16>
    %71 = vector.shape_cast %70 : vector<8x8x4xbf16> to vector<64x4xbf16>
    %c0_64 = arith.constant 0 : index
    %c0_65 = arith.constant 0 : index
    %72 = vector.load %arg3[%c0_64, %c0_65] : memref<4x128xbf16, #tpu.memory_space<vmem>>, vector<4x128xbf16>
    %cst_66 = arith.constant dense<0.000000e+00> : vector<64x128xf32>
    %73 = tpu.matmul %71, %72, %cst_66 {dimension_numbers = #tpu.dot_dimension_numbers<[1], [0], [0], [1], [0, 0, 1, 1], [], []>} : vector<64x4xbf16>, vector<4x128xbf16>, vector<64x128xf32> -> vector<64x128xf32>
    %cst_67 = arith.constant dense<0.000000e+00> : vector<128xf32>
    %74 = vector.multi_reduction <add>, %73, %cst_67 [0] : vector<64x128xf32> to vector<128xf32>
    %75 = vector.shape_cast %74 : vector<128xf32> to vector<1x128xf32>
    %c0_68 = arith.constant 0 : index
    %c0_69 = arith.constant 0 : index
    %c0_70 = arith.constant 0 : index
    %76 = vector.load %arg7[%c0_68, %c0_69, %c0_70] : memref<1x2x128xf32, #tpu.memory_space<vmem>>, vector<1x1x128xf32>
    %77 = vector.shape_cast %76 : vector<1x1x128xf32> to vector<1x128xf32>
    %78 = vector.shape_cast %75 : vector<1x128xf32> to vector<1x1x128xf32>
    tpu.vector_store %arg7[%c0_68, %c0_69, %c0_70], %78 {strides = array<i32>} : memref<1x2x128xf32, #tpu.memory_space<vmem>>, vector<1x1x128xf32>,
    %79 = arith.mulf %73, %73 : vector<64x128xf32>
    %cst_71 = arith.constant dense<0.000000e+00> : vector<128xf32>
    %80 = vector.multi_reduction <add>, %79, %cst_71 [0] : vector<64x128xf32> to vector<128xf32>
    %81 = vector.shape_cast %80 : vector<128xf32> to vector<1x128xf32>
    %c0_72 = arith.constant 0 : index
    %c1_73 = arith.constant 1 : index
    %c0_74 = arith.constant 0 : index
    %82 = vector.load %arg7[%c0_72, %c1_73, %c0_74] : memref<1x2x128xf32, #tpu.memory_space<vmem>>, vector<1x1x128xf32>
    %83 = vector.shape_cast %82 : vector<1x1x128xf32> to vector<1x128xf32>
    %84 = vector.shape_cast %81 : vector<1x128xf32> to vector<1x1x128xf32>
    tpu.vector_store %arg7[%c0_72, %c1_73, %c0_74], %84 {strides = array<i32>} : memref<1x2x128xf32, #tpu.memory_space<vmem>>, vector<1x1x128xf32>,
    %85 = vector.shape_cast %73 : vector<64x128xf32> to vector<8x8x128xf32>
    %86 = arith.truncf %85 : vector<8x8x128xf32> to vector<8x8x128xbf16>
    %c0_75 = arith.constant 0 : index
    %c0_76 = arith.constant 0 : index
    %c0_77 = arith.constant 0 : index
    %c0_78 = arith.constant 0 : index
    %87 = vector.load %arg5[%c0_75, %c0_76, %c0_77, %c0_78] : memref<1x8x8x128xbf16, #tpu.memory_space<vmem>>, vector<1x8x8x128xbf16>
    %88 = vector.shape_cast %87 : vector<1x8x8x128xbf16> to vector<8x8x128xbf16>
    %89 = vector.shape_cast %86 : vector<8x8x128xbf16> to vector<1x8x8x128xbf16>
    tpu.vector_store %arg5[%c0_75, %c0_76, %c0_77, %c0_78], %89 {strides = array<i32>} : memref<1x8x8x128xbf16, #tpu.memory_space<vmem>>, vector<1x8x8x128xbf16>,
    return
  }
  func.func @transform_0(%arg0: i32) -> (i32, i32, i32, i32) {
    %c0_i32 = arith.constant 0 : i32
    %c0_i32_0 = arith.constant 0 : i32
    %c0_i32_1 = arith.constant 0 : i32
    %c0_i32_2 = arith.constant 0 : i32
    return %arg0, %c0_i32, %c0_i32_0, %c0_i32_1 : i32, i32, i32, i32
  }
  func.func @transform_1(%arg0: i32) -> (i32, i32) {
    %c0_i32 = arith.constant 0 : i32
    %c0_i32_0 = arith.constant 0 : i32
    %c0_i32_1 = arith.constant 0 : i32
    return %c0_i32, %c0_i32_0 : i32, i32
  }
  func.func @transform_2(%arg0: i32) -> (i32, i32) {
    %c0_i32 = arith.constant 0 : i32
    %c0_i32_0 = arith.constant 0 : i32
    %c0_i32_1 = arith.constant 0 : i32
    return %c0_i32, %c0_i32_0 : i32, i32
  }
  func.func @transform_3(%arg0: i32) -> (i32, i32, i32, i32) {
    %c0_i32 = arith.constant 0 : i32
    %c0_i32_0 = arith.constant 0 : i32
    %c0_i32_1 = arith.constant 0 : i32
    %c0_i32_2 = arith.constant 0 : i32
    return %arg0, %c0_i32, %c0_i32_0, %c0_i32_1 : i32, i32, i32, i32
  }
  func.func @transform_4(%arg0: i32) -> (i32, i32, i32, i32) {
    %c0_i32 = arith.constant 0 : i32
    %c0_i32_0 = arith.constant 0 : i32
    %c0_i32_1 = arith.constant 0 : i32
    %c0_i32_2 = arith.constant 0 : i32
    return %arg0, %c0_i32, %c0_i32_0, %c0_i32_1 : i32, i32, i32, i32
  }
  func.func @transform_5(%arg0: i32) -> (i32, i32, i32) {
    %c0_i32 = arith.constant 0 : i32
    %c0_i32_0 = arith.constant 0 : i32
    %c0_i32_1 = arith.constant 0 : i32
    return %arg0, %c0_i32, %c0_i32_0 : i32, i32, i32
  }
  func.func @transform_6(%arg0: i32) -> (i32, i32, i32) {
    %c0_i32 = arith.constant 0 : i32
    %c0_i32_0 = arith.constant 0 : i32
    %c0_i32_1 = arith.constant 0 : i32
    return %arg0, %c0_i32, %c0_i32_0 : i32, i32, i32
  }
}

</mosaic_0001>

<bundles_post_ra>
// kernel: tpu_custom_call.1
= control target key start
LH: loop header
LB: loop body
LE: loop exit
PB: predicated region body
PF: predicated region fallthrough
CT: control target
= control target key end

     0   :  { %12 = vsyncpa [#allocation3], 0  ;;  %s3336_s0 = inlined_call_operand.vmem [shape: bf16[2,36,9,4], index: 0, kind: input, shape index: {}]   ;;  %s3337_s1 = inlined_call_operand.vmem [shape: bf16[36,128], index: 1, kind: input, shape index: {}]   ;;  %s3338_s2 = inlined_call_operand.vmem [shape: bf16[4,128], index: 2, kind: input, shape index: {}]   ;;  %s3339_s3 = inlined_call_operand.hbm [shape: bf16[2,8,8,128], index: 3, kind: output, shape index: {0}]   ;;  %s3340_s4 = inlined_call_operand.hbm [shape: bf16[2,8,8,128], index: 4, kind: output, shape index: {1}]   ;;  %s3341_s5 = inlined_call_operand.hbm [shape: f32[2,2,128], index: 5, kind: output, shape index: {2}]   ;;  %s3342_s6 = inlined_call_operand.hbm [shape: f32[2,2,128], index: 6, kind: output, shape index: {3}]  }
   0x1   :  { %14 = vsyncpa [#allocation3 + $0x1], 0 }
   0x2   :  { %15 = vsyncpa [#allocation5], 0 }
   0x3   :  { %17 = vsyncpa [#allocation5 + $0x1], 0 }
   0x4   :  { %18 = vsyncpa [#allocation8], 0 }
   0x5   :  { %20 = vsyncpa [#allocation8 + $0x1], 0  ;;  %s2860_s21 = smov 0   ;;  %s2862_s22 = smov 0  }
   0x6   :  { %s2864_s23 = smov 0   ;;  %s2866_s24 = smov 0  }
   0x7 LB: > { %s2881_s25 = sadd.s32 4294967295, %s2817_s24   ;;  %s3343_s26 = sadd.s32 4294967294, %s2817_s24   ;;  %s2817_s24 = sphi %s2866_s24, %s3352_s24   ;;  %s2813_s23 = sphi %s2864_s23, %s3351_s23   ;;  %s2809_s22 = sphi %s2862_s22, %s3350_s22   ;;  %s2805_s21 = sphi %s2860_s21, %s3349_s21  }
   0x8   : > { %s2885_s27 = sadd.s32 1, %s2817_s24   ;;  %s101_s28 = sadd.s32 1, %s2813_s23 }
   0x9   : > { %s98_s29 = ssub.s32 %s2817_s24, %s2885_s27  ;;  %p111_p0 = scmp.ne.s32.totalorder %s2813_s23, %s2809_s22 }
   0xa   : > { %p99_p1 = scmp.eq.s32.totalorder %s98_s29, 0  ;;  %p112_p2 = scmp.eq.s32.totalorder %s2881_s25, 1 }
   0xb   : > { %p117_p3 = scmp.ne.s32.totalorder %s2809_s22, %s2805_s21  ;;  %p118_p4 = scmp.eq.s32.totalorder %s3343_s26, 1 }
   0xc   : > { %s2898_s30 = scalar_select %p99_p1, %s2813_s23, %s101_s28  }
   0xd   : > { %p2900_p5 = por %p112_p2, %p111_p0  ;;  %p2904_p6 = por %p118_p4, %p117_p3 }
   0xe   : > { %p2120_p7 = scmp.ge.s32.totalorder %s2817_s24, 1  ;;  %p228_p8 = scmp.lt.s32.totalorder %s2817_s24, 3 }
  0x10   : > { %p229_p9 = pnand %p2120_p7, %p228_p8 }
  0x11   : > { %vm335_vm0 = vcmask (!%p229_p9), 1041408   ;;  %v867_v0 = vld [vmem:[%s3337_s1 + $0x8] sm:$0x3] (!%p229_p9)  ;;  %p273_p10 = scmp.lt.s32.totalorder (!%p229_p9), %s2881_s25, 1  ;;  %v287_v5 = vld [vmem:[%s3337_s1] sm:$0x3] (!%p229_p9) }
  0x12   : > { %232 = sbr.rel (%p229_p9) target bundleno = 419 (0x1a3), region = 32  ;;  %2568 = vmatprep.subr.msk.bf16.mxu0 (!%p229_p9), %vm335_vm0, %v867_v0  ;;  %v2631_v1 = vld [vmem:[%s3337_s1] ss:$0 sps:$4 sm:$0xcc] (!%p229_p9)   ;;  %v901_v2 = vsel (!%p229_p9), %vm335_vm0, %v867_v0, 0  ;;  %vm322_vm1 = vcmask (!%p229_p9), 31744  }
  0x13   : > { %2441 = vmatpush3.bf16.msra.mxu0 (!%p229_p9), %v901_v2  ;;  %v2634_v3 = vld [vmem:[%s3337_s1 + $0x8] ss:$0 sps:$4 sm:$0xcc] (!%p229_p9)   ;;  %v321_v4 = vrot.slane (!%p229_p9), %v2631_v1, 2  ;;  %v437_v9 = vsel (!%p229_p9), %vm335_vm0, %v287_v5, 0  ;;  %s3142_s20 = sand.u32 (!%p229_p9), 1, %s2809_s22  }
  0x14   : > { %v1120_v6 = vrot.slane (!%p229_p9), %v2634_v3, 2  ;;  %v2944_v13 = vld [vmem:[%s3337_s1 + $0xc] sm:$0x3] (!%p229_p9)  ;;  %v635_v15 = vld [vmem:[%s3337_s1 + $0x4] sm:$0x3] (!%p229_p9)  ;;  %s2302_s12 = sshll.u32 (!%p229_p9), %s2881_s25, 9 }
  0x15   : > { %2564 = vmatprep.subr.msk.bf16.mxu1 (!%p229_p9), %vm335_vm0, %v321_v4  ;;  %v337_v7 = vsel (!%p229_p9), %vm335_vm0, %v321_v4, 0  ;;  %vm520_vm2 = vsmask.f32 (!%p229_p9), 3328  ;;  %vm521_vm3 = vsmask.f32 (!%p229_p9), 7440  ;;  %v661_v57 = vsel (!%p229_p9), %vm335_vm0, %v635_v15, 0  ;;  %s3168_s16 = scalar_lea.hbm (!%p229_p9), %s3339_s3, %s2302_s12  ;;  %s3177_s19 = scalar_lea.hbm (!%p229_p9), %s3340_s4, %s2302_s12 }
  0x16   : > { %2401 = vmatpush3.bf16.msra.mxu1 (!%p229_p9), %v337_v7  ;;  %2569 = vmatprep.subr.msk.bf16.mxu0 (!%p229_p9), %vm335_vm0, %v1120_v6  ;;  %v1134_v8 = vsel (!%p229_p9), %vm335_vm0, %v1120_v6, 0  ;;  %vm2977_vm4 = vmor (!%p229_p9), %vm520_vm2, %vm521_vm3  ;;  %s2819_s12 = smov (!%p229_p9), [#allocation2]  }
  0x17   : > { %2565 = vmatprep.subr.msk.bf16.mxu1 (!%p229_p9), %vm335_vm0, %v287_v5  ;;  %s2667_s15 = sshll.u32 (!%p229_p9), %s2819_s12, 4  ;;  %s2668_s15 = int_to_ptr.vmem [resolvable:$false] %s2667_s15 }
  0x18   : > { %s2669_s17 = scalar_lea.vmem (!%p229_p9), %s2668_s15, 1024 }
  0x19   : > { %s274_s13 = scalar_select %p273_p10, %s2881_s25, 1 }
  0x1b   : > { %s2574_s18 = smul.u32 288, %s274_s13  ;;  %s1896_s13 = sand.u32 1, %s2881_s25  }
  0x1d   : > { %s2931_s28 = scalar_lea.vmem %s3336_s0, %s2574_s18 }
  0x1e   : > { %v2632_v10 = vld [vmem:[%s2931_s28 + $0x48] ss:$8 sps:$4 sm:$0xff]   ;;  %v2633_v11 = vld [vmem:[%s2931_s28 + $0xd8] ss:$8 sps:$4 sm:$0xff]   ;;  %v2193_v22 = vld [vmem:[%s2931_s28 + $0x94] sm:$0x1] }
  0x1f   : > { %2402 = vmatprep.mubr.msk.bf16.mxu1 %vm322_vm1, %v2632_v10  ;;  %v2635_v12 = vld [vmem:[%s2931_s28 + $0x58] ss:$8 sps:$4 sm:$0xff]   ;;  %2442 = vmatprep.mubr.msk.bf16.mxu0 %vm322_vm1, %v2633_v11  ;;  %v2636_v14 = vld [vmem:[%s2931_s28 + $0xe8] ss:$8 sps:$4 sm:$0xff]   ;;  %v2195_v24 = vld [vmem:[%s2931_s28 + $0x9c] sm:$0x1] }
  0x20   : > { %2403 = vmatmul.mubr.msk.bf16.vlgmr.msra.gmra.mrb[0].mxu1 %vm322_vm1, %v2635_v12  ;;  %v2637_v16 = vld [vmem:[%s2931_s28 + $0x68] ss:$8 sps:$4 sm:$0xff]   ;;  %2443 = vmatmul.mubr.msk.bf16.vlgmr.msra.gmra.mrb[0].mxu0 %vm322_vm1, %v2636_v14  ;;  %v2638_v17 = vld [vmem:[%s2931_s28 + $0xf8] ss:$8 sps:$4 sm:$0xff]   ;;  %v1002_v27 = vshll.u32 %v2193_v22, 16  ;;  %v1016_v30 = vshll.u32 %v2195_v24, 16 }
  0x21   : > { %2411 = vmatpush3.bf16.msra.mxu1 %v437_v9  ;;  %2451 = vmatpush3.bf16.msra.mxu0 %v1134_v8  ;;  %v2639_v18 = vld [vmem:[%s2931_s28 + $0x78] ss:$8 sps:$4 sm:$0xff]   ;;  %v2640_v19 = vld [vmem:[%s2931_s28 + $0x108] ss:$8 sps:$4 sm:$0xff]   ;;  %v2197_v38 = vld [vmem:[%s2931_s28 + $0xa4] sm:$0x1] }
  0x22   : > { %2406 = vmatprep.mubr.msk.bf16.mxu1 %vm322_vm1, %v2637_v16  ;;  %2446 = vmatprep.mubr.msk.bf16.mxu0 %vm322_vm1, %v2638_v17  ;;  %v2641_v20 = vld [vmem:[%s2931_s28] ss:$8 sps:$4 sm:$0xff]   ;;  %v2192_v21 = vld [vmem:[%s2931_s28 + $0x90] sm:$0xf]  ;;  %v2194_v23 = vld [vmem:[%s2931_s28 + $0x98] sm:$0xf] }
  0x23   : > { %2570 = vmatprep.subr.msk.bf16.mxu0 %vm335_vm0, %v2944_v13  ;;  %2566 = vmatprep.subr.msk.bf16.mxu1 %vm335_vm0, %v635_v15  ;;  %v993_v25 = vshrl.u32 %v2192_v21, 16  ;;  %v996_v26 = vshll.u32 %v2192_v21, 16  ;;  %v1007_v28 = vshrl.u32 %v2194_v23, 16  ;;  %v1010_v29 = vshll.u32 %v2194_v23, 16  ;;  %v2196_v37 = vld [vmem:[%s2931_s28 + $0xa0] sm:$0xf] }
  0x24   : > { %v1004_v33 = vrot.slane %v1002_v27, 5  ;;  %v1018_v36 = vrot.slane %v1016_v30, 5  ;;  %v2642_v40 = vld [vmem:[%s2931_s28 + $0x10] ss:$8 sps:$4 sm:$0xff]   ;;  %v2198_v41 = vld [vmem:[%s2931_s28 + $0xa8] sm:$0xf] }
  0x25   : > { %v995_v31 = vrot.slane %v993_v25, 4  ;;  %v998_v32 = vrot.slane %v996_v26, 5  ;;  %v1009_v34 = vrot.slane %v1007_v28, 4  ;;  %v1012_v35 = vrot.slane %v1010_v29, 5  ;;  %v2199_v42 = vld [vmem:[%s2931_s28 + $0xac] sm:$0x1] }
  0x26   : > { %v1021_v43 = vshrl.u32 %v2196_v37, 16  ;;  %v1024_v44 = vshll.u32 %v2196_v37, 16  ;;  %v1030_v47 = vshll.u32 %v2197_v38, 16  ;;  %v1035_v48 = vshrl.u32 %v2198_v41, 16  ;;  %v2643_v58 = vld [vmem:[%s2931_s28 + $0x20] ss:$8 sps:$4 sm:$0xff]  }
  0x27   : > { %v999_v39 = vor.u32 %v998_v32, %v995_v31  ;;  %v1013_v46 = vor.u32 %v1012_v35, %v1009_v34  ;;  %v1038_v49 = vshll.u32 %v2198_v41, 16  ;;  %v1044_v53 = vshll.u32 %v2199_v42, 16  ;;  %v2200_v63 = vld [vmem:[%s2931_s28 + $0xb0] sm:$0xf]  ;;  %v2201_v0 = vld [vmem:[%s2931_s28 + $0xb4] sm:$0x1] }
  0x28   : > { %2407 = vmatmul.mubr.msk.bf16.gmra.mrb[4].mxu1 %vm322_vm1, %v2639_v18  ;;  %2447 = vmatmul.mubr.msk.bf16.gmra.mrb[4].mxu0 %vm322_vm1, %v2640_v19  ;;  %v1023_v51 = vrot.slane %v1021_v43, 4  ;;  %v1026_v52 = vrot.slane %v1024_v44, 5  ;;  %v1037_v55 = vrot.slane %v1035_v48, 4  ;;  %v1032_v61 = vrot.slane %v1030_v47, 5  ;;  %v2202_v3 = vld [vmem:[%s2931_s28 + $0xb8] sm:$0xf] }
  0x29   : > { %2412 = vmatprep.mubr.msk.bf16.mxu1 %vm322_vm1, %v2641_v20  ;;  %v1000_v50 = vrot.slane %v999_v39, 4  ;;  %v1014_v54 = vrot.slane %v1013_v46, 4  ;;  %v1040_v56 = vrot.slane %v1038_v49, 5  ;;  %v1046_v62 = vrot.slane %v1044_v53, 5  ;;  %v2203_v4 = vld [vmem:[%s2931_s28 + $0xbc] sm:$0x1] }
  0x2a   : > { %v1027_v60 = vor.u32 %v1026_v52, %v1023_v51  ;;  %v1049_v5 = vshrl.u32 %v2200_v63, 16  ;;  %v1052_v6 = vshll.u32 %v2200_v63, 16  ;;  %v1058_v9 = vshll.u32 %v2201_v0, 16  ;;  %v2644_v20 = vld [vmem:[%s2931_s28 + $0x30] ss:$8 sps:$4 sm:$0xff]  }
  0x2b   : > { %v1005_v59 = vsel %vm2977_vm4, %v1000_v50, %v1004_v33  ;;  %v1019_v1 = vsel %vm2977_vm4, %v1014_v54, %v1018_v36  ;;  %v1041_v2 = vor.u32 %v1040_v56, %v1037_v55  ;;  %v1063_v10 = vshrl.u32 %v2202_v3, 16  ;;  %v2204_v25 = vld [vmem:[%s2931_s28 + $0xc0] sm:$0xf]  ;;  %v2205_v26 = vld [vmem:[%s2931_s28 + $0xc4] sm:$0x1] }
  0x2c   : > { %v2208_v7 = vcombine.low %v1005_v59, %v1019_v1  ;;  %v1028_v8 = vrot.slane %v1027_v60, 4  ;;  %v1051_v12 = vrot.slane %v1049_v5, 4  ;;  %v1054_v14 = vrot.slane %v1052_v6, 5  ;;  %v2206_v29 = vld [vmem:[%s2931_s28 + $0xc8] sm:$0xf] }
  0x2d   : > { %v1042_v11 = vrot.slane %v1041_v2, 4  ;;  %v1066_v15 = vshll.u32 %v2202_v3, 16  ;;  %v1252_v17 = vsel %vm335_vm0, %v2944_v13, 0  ;;  %v1065_v18 = vrot.slane %v1063_v10, 4  ;;  %v2207_v30 = vld [vmem:[%s2931_s28 + $0xcc] sm:$0x1] }
  0x2e   : > { %2452 = vmatprep.mubr.msk.bf16.mxu0 %vm322_vm1, %v2208_v7  ;;  %v1033_v16 = vsel %vm2977_vm4, %v1028_v8, %v1032_v61  ;;  %v1072_v19 = vshll.u32 %v2203_v4, 16  ;;  %v1055_v22 = vor.u32 %v1054_v14, %v1051_v12  ;;  %v1060_v23 = vrot.slane %v1058_v9, 5  ;;  %v504_v35 = vld [vmem:[%s2931_s28] sm:$0xf]  ;;  %v506_v46 = vld [vmem:[%s2931_s28 + $0x8] sm:$0xf] }
  0x2f   : > { %v1047_v21 = vsel %vm2977_vm4, %v1042_v11, %v1046_v62  ;;  %v1068_v24 = vrot.slane %v1066_v15, 5  ;;  %v1077_v31 = vshrl.u32 %v2204_v25, 16  ;;  %v1080_v33 = vshll.u32 %v2204_v25, 16  ;;  %v507_v50 = vld [vmem:[%s2931_s28 + $0xc] sm:$0x1] }
  0x30   : > { %2413 = vmatmul.mubr.msk.bf16.vlgmr.msra.gmra.mrb[0].mxu1 %vm322_vm1, %v2642_v40  ;;  %v2209_v27 = vcombine.low %v1033_v16, %v1047_v21  ;;  %v1074_v28 = vrot.slane %v1072_v19, 5  ;;  %v1056_v32 = vrot.slane %v1055_v22, 4  ;;  %v1086_v34 = vshll.u32 %v2205_v26, 16  ;;  %v505_v40 = vld [vmem:[%s2931_s28 + $0x4] sm:$0x1] }
  0x31   : > { %2421 = vmatpush3.bf16.msra.mxu1 %v661_v57  ;;  %2416 = vmatprep.mubr.msk.bf16.mxu1 %vm322_vm1, %v2643_v58  ;;  %v1069_v13 = vor.u32 %v1068_v24, %v1065_v18  ;;  %v1079_v36 = vrot.slane %v1077_v31, 4  ;;  %v1091_v37 = vshrl.u32 %v2206_v29, 16  ;;  %v1094_v38 = vshll.u32 %v2206_v29, 16  ;;  %v508_v60 = vld [vmem:[%s2931_s28 + $0x10] sm:$0xf] }
  0x32   : > { %2453 = vmatmul.mubr.msk.bf16.vlgmr.msra.gmra.mrb[0].mxu0 %vm322_vm1, %v2209_v27  ;;  %v1100_v39 = vshll.u32 %v2207_v30, 16  ;;  %v1061_v41 = vsel %vm2977_vm4, %v1056_v32, %v1060_v23  ;;  %v1082_v43 = vrot.slane %v1080_v33, 5  ;;  %v1088_v44 = vrot.slane %v1086_v34, 5  ;;  %v509_v1 = vld [vmem:[%s2931_s28 + $0x14] sm:$0x1] }
  0x33   : > { %2461 = vmatpush3.bf16.msra.mxu0 %v1252_v17  ;;  %v1070_v42 = vrot.slane %v1069_v13, 4  ;;  %v1093_v47 = vrot.slane %v1091_v37, 4  ;;  %v1096_v48 = vrot.slane %v1094_v38, 5  ;;  %v524_v51 = vshrl.u32 %v504_v35, 16  ;;  %v2645_v5 = vld [vmem:[%s2931_s28 + $0x8] ss:$8 sps:$4 sm:$0xff]  }
  0x34   : > { %v1102_v49 = vrot.slane %v1100_v39, 5  ;;  %v1083_v53 = vor.u32 %v1082_v43, %v1079_v36  ;;  %v527_v54 = vshll.u32 %v504_v35, 16  ;;  %v533_v55 = vshll.u32 %v505_v40, 16  ;;  %v2646_v6 = vld [vmem:[%s3337_s1 + $0xc] ss:$0 sps:$4 sm:$0xcc]  }
  0x35   : > { %v1075_v52 = vsel %vm2977_vm4, %v1070_v42, %v1074_v28  ;;  %v1097_v57 = vor.u32 %v1096_v48, %v1093_v47  ;;  %v526_v58 = vrot.slane %v524_v51, 4  ;;  %v538_v59 = vshrl.u32 %v506_v46, 16  ;;  %v510_v10 = vld [vmem:[%s2931_s28 + $0x18] sm:$0xf]  ;;  %v511_v11 = vld [vmem:[%s2931_s28 + $0x1c] sm:$0x1] }
  0x36   : > { %v2210_v56 = vcombine.low %v1061_v41, %v1075_v52  ;;  %v1084_v61 = vrot.slane %v1083_v53, 4  ;;  %v529_v62 = vrot.slane %v527_v54, 5  ;;  %v535_v63 = vrot.slane %v533_v55, 5  ;;  %v2648_v30 = vld [vmem:[%s3337_s1 + $0x4] ss:$0 sps:$4 sm:$0xcc]  }
  0x37   : > { %v541_v0 = vshll.u32 %v506_v46, 16  ;;  %v1098_v2 = vrot.slane %v1097_v57, 4  ;;  %v540_v3 = vrot.slane %v538_v59, 4  ;;  %v547_v4 = vshll.u32 %v507_v50, 16  ;;  %v512_v34 = vld [vmem:[%s2931_s28 + $0x20] sm:$0xf] }
  0x38   : > { %2417 = vmatmul.mubr.msk.bf16.gmra.mrb[4].mxu1 %vm322_vm1, %v2644_v20  ;;  %2456 = vmatprep.mubr.msk.bf16.mxu0 %vm322_vm1, %v2210_v56  ;;  %v1089_v7 = vsel %vm2977_vm4, %v1084_v61, %v1088_v44  ;;  %v530_v8 = vor.u32 %v529_v62, %v526_v58  ;;  %v552_v12 = vshrl.u32 %v508_v60, 16  ;;  %v1360_v16 = vrot.slane %v2646_v6, 2  ;;  %v2647_v37 = vld [vmem:[%s2931_s28 + $0x18] ss:$8 sps:$4 sm:$0xff]   ;;  %v513_v39 = vld [vmem:[%s2931_s28 + $0x24] sm:$0x1] }
  0x39   : > { %v543_v9 = vrot.slane %v541_v0, 5  ;;  %v1103_v14 = vsel %vm2977_vm4, %v1098_v2, %v1102_v49  ;;  %v549_v15 = vrot.slane %v547_v4, 5  ;;  %v555_v17 = vshll.u32 %v508_v60, 16  ;;  %v514_v40 = vld [vmem:[%s2931_s28 + $0x28] sm:$0xf] }
  0x3a   : > { %v2211_v18 = vcombine.low %v1089_v7, %v1103_v14  ;;  %v531_v19 = vrot.slane %v530_v8, 4  ;;  %v554_v21 = vrot.slane %v552_v12, 4  ;;  %2571 = vmatprep.subr.msk.bf16.mxu0 %vm335_vm0, %v1360_v16  ;;  %v561_v23 = vshll.u32 %v509_v1, 16  ;;  %v515_v44 = vld [vmem:[%s2931_s28 + $0x2c] sm:$0x1] }
  0x3b   : > { %v544_v20 = vor.u32 %v543_v9, %v540_v3  ;;  %v557_v22 = vrot.slane %v555_v17, 5  ;;  %v566_v24 = vshrl.u32 %v510_v10, 16  ;;  %v569_v25 = vshll.u32 %v510_v10, 16  ;;  %v2649_v55 = vld [vmem:[%s2931_s28 + $0x28] ss:$8 sps:$4 sm:$0xff]  }
  0x3c   : > { %2457 = vmatmul.mubr.msk.bf16.gmra.mrb[4].mxu0 %vm322_vm1, %v2211_v18  ;;  %v536_v26 = vsel %vm2977_vm4, %v531_v19, %v535_v63  ;;  %v575_v28 = vshll.u32 %v511_v11, 16  ;;  %v1374_v29 = vsel %vm335_vm0, %v1360_v16, 0  ;;  %v563_v32 = vrot.slane %v561_v23, 5  ;;  %v516_v60 = vld [vmem:[%s2931_s28 + $0x30] sm:$0xf] }
  0x3d   : > { %v545_v27 = vrot.slane %v544_v20, 4  ;;  %2462 = vmatprep.mubr.msk.bf16.mxu0 %vm322_vm1, %v2645_v5  ;;  %v558_v31 = vor.u32 %v557_v22, %v554_v21  ;;  %v568_v13 = vrot.slane %v566_v24, 4  ;;  %v571_v33 = vrot.slane %v569_v25, 5  ;;  %v517_v63 = vld [vmem:[%s2931_s28 + $0x34] sm:$0x1] }
  0x3e   : > { %v577_v36 = vrot.slane %v575_v28, 5  ;;  %v769_v38 = vrot.slane %v2648_v30, 2  ;;  %v580_v46 = vshrl.u32 %v512_v34, 16  ;;  %v583_v48 = vshll.u32 %v512_v34, 16  ;;  %v518_v0 = vld [vmem:[%s2931_s28 + $0x38] sm:$0xf] }
  0x3f   : > { %v550_v35 = vsel %vm2977_vm4, %v545_v27, %v549_v15  ;;  %v559_v42 = vrot.slane %v558_v31, 4  ;;  %v572_v43 = vor.u32 %v571_v33, %v568_v13  ;;  %v589_v49 = vshll.u32 %v513_v39, 16  ;;  %v519_v5 = vld [vmem:[%s2931_s28 + $0x3c] sm:$0x1]  ;;  %v2650_v22 = vld [vmem:[%s2931_s28 + $0x38] ss:$8 sps:$4 sm:$0xff]  }
  0x40   : > { %v2151_v41 = vcombine.low %v536_v26, %v550_v35  ;;  %2567 = vmatprep.subr.msk.bf16.mxu1 %vm335_vm0, %v769_v38  ;;  %v783_v47 = vsel %vm335_vm0, %v769_v38, 0  ;;  %v594_v50 = vshrl.u32 %v514_v40, 16  ;;  %v582_v53 = vrot.slane %v580_v46, 4  ;;  %v2652_v24 = vld [vmem:[%s2931_s28 + $0x50] ss:$8 sps:$4 sm:$0xff]  }
  0x41   : > { %v564_v51 = vsel %vm2977_vm4, %v559_v42, %v563_v32  ;;  %v573_v52 = vrot.slane %v572_v43, 4  ;;  %v597_v54 = vshll.u32 %v514_v40, 16  ;;  %v585_v56 = vrot.slane %v583_v48, 5  ;;  %v1738_v32 = vld [vmem:[%s3338_s2] sm:$0x3] }
  0x42   : > { %2422 = vmatprep.mubr.msk.bf16.mxu1 %vm322_vm1, %v2151_v41  ;;  %v591_v57 = vrot.slane %v589_v49, 5  ;;  %v596_v58 = vrot.slane %v594_v50, 4  ;;  %v603_v59 = vshll.u32 %v515_v44, 16  ;;  %v608_v1 = vshrl.u32 %v516_v60, 16  ;;  %v2651_v33 = vld [vmem:[%s2931_s28 + $0x90] ss:$8 sps:$4 sm:$0xff]  }
  0x43   : > { %v578_v61 = vsel %vm2977_vm4, %v573_v52, %v577_v36  ;;  %v599_v62 = vrot.slane %v597_v54, 5  ;;  %v586_v3 = vor.u32 %v585_v56, %v582_v53  ;;  %v611_v6 = vshll.u32 %v516_v60, 16  ;;  %v2654_v35 = vld [vmem:[%s2931_s28 + $0x60] ss:$8 sps:$4 sm:$0xff]   ;;  %v2656_v38 = vld [vmem:[%s2931_s28 + $0x70] ss:$8 sps:$4 sm:$0xff]  }
  0x44   : > { %v2152_v2 = vcombine.low %v564_v51, %v578_v61  ;;  %2463 = vmatmul.mubr.msk.bf16.vlgmr.msra.gmra.mrb[0].mxu0 %vm322_vm1, %v2647_v37  ;;  %v605_v4 = vrot.slane %v603_v59, 5  ;;  %v610_v8 = vrot.slane %v608_v1, 4  ;;  %v617_v9 = vshll.u32 %v517_v63, 16  ;;  %v2250_v39 = vld [vmem:[%s2931_s28 + $0x8] sm:$0xf] }
  0x45   : > { %2471 = vmatpush3.bf16.msra.mxu0 %v1374_v29  ;;  %v600_v7 = vor.u32 %v599_v62, %v596_v58  ;;  %2466 = vmatprep.mubr.msk.bf16.mxu0 %vm322_vm1, %v2649_v55  ;;  %v622_v10 = vshrl.u32 %v518_v0, 16  ;;  %v587_v11 = vrot.slane %v586_v3, 4  ;;  %v613_v12 = vrot.slane %v611_v6, 5  ;;  %v1577_v29 = vld [vmem:[%s3337_s1 + $0x10] sm:$0x3] }
  0x46   : > { %2423 = vmatmul.mubr.msk.bf16.vlgmr.msra.gmra.mrb[0].mxu1 %vm322_vm1, %v2152_v2  ;;  %v625_v14 = vshll.u32 %v518_v0, 16  ;;  %v631_v15 = vshll.u32 %v519_v5, 16  ;;  %v619_v20 = vrot.slane %v617_v9, 5  ;;  %2572 = vmatprep.subr.msk.bf16.mxu0 %vm335_vm0, %v1577_v29  ;;  %v1603_v36 = vsel %vm335_vm0, %v1577_v29, 0  ;;  %v2251_v40 = vld [vmem:[%s2931_s28 + $0xc] sm:$0x1] }
  0x47   : > { %2431 = vmatpush3.bf16.msra.mxu1 %v783_v47  ;;  %v601_v16 = vrot.slane %v600_v7, 4  ;;  %v624_v17 = vrot.slane %v622_v10, 4  ;;  %v592_v18 = vsel %vm2977_vm4, %v587_v11, %v591_v57  ;;  %v614_v19 = vor.u32 %v613_v12, %v610_v8  ;;  %v2252_v41 = vld [vmem:[%s2931_s28 + $0x10] sm:$0xf]  ;;  %v2253_v42 = vld [vmem:[%s2931_s28 + $0x14] sm:$0x1] }
  0x48   : > { %v627_v21 = vrot.slane %v625_v14, 5  ;;  %v633_v28 = vrot.slane %v631_v15, 5  ;;  %2573 = vmatprep.subr.msk.bf16.mxu1 %vm335_vm0, %v1738_v32  ;;  %v1772_v37 = vsel %vm335_vm0, %v1738_v32, 0  ;;  %v2653_v43 = vld [vmem:[%s2931_s28 + $0xa0] ss:$8 sps:$4 sm:$0xff]   ;;  %v1466_v44 = vshrl.u32 %v2250_v39, 16 }
  0x49   : > { %v606_v23 = vsel %vm2977_vm4, %v601_v16, %v605_v4  ;;  %v615_v26 = vrot.slane %v614_v19, 4  ;;  %v1469_v46 = vshll.u32 %v2250_v39, 16  ;;  %v1475_v47 = vshll.u32 %v2251_v40, 16  ;;  %v2655_v49 = vld [vmem:[%s2931_s28 + $0xb0] ss:$8 sps:$4 sm:$0xff]  }
  0x4a   : > { %v2153_v25 = vcombine.low %v592_v18, %v606_v23  ;;  %v628_v27 = vor.u32 %v627_v21, %v624_v17  ;;  %v1480_v48 = vshrl.u32 %v2252_v41, 16  ;;  %v1483_v50 = vshll.u32 %v2252_v41, 16  ;;  %v2254_v56 = vld [vmem:[%s2931_s28 + $0x18] sm:$0xf]  ;;  %v2658_v57 = vld [vmem:[%s2931_s28 + $0x80] ss:$8 sps:$4 sm:$0xff]  }
  0x4b   : > { %v620_v30 = vsel %vm2977_vm4, %v615_v26, %v619_v20  ;;  %v1489_v51 = vshll.u32 %v2253_v42, 16  ;;  %v1468_v52 = vrot.slane %v1466_v44, 4  ;;  %v1471_v53 = vrot.slane %v1469_v46, 5  ;;  %v2255_v60 = vld [vmem:[%s2931_s28 + $0x1c] sm:$0x1] }
  0x4c   : > { %2426 = vmatprep.mubr.msk.bf16.mxu1 %vm322_vm1, %v2153_v25  ;;  %v629_v31 = vrot.slane %v628_v27, 4  ;;  %2467 = vmatmul.mubr.msk.bf16.gmra.mrb[4].mxu0 %vm322_vm1, %v2650_v22  ;;  %v1477_v54 = vrot.slane %v1475_v47, 5  ;;  %v1482_v55 = vrot.slane %v1480_v48, 4  ;;  %v1485_v58 = vrot.slane %v1483_v50, 5  ;;  %v2256_v61 = vld [vmem:[%s2931_s28 + $0x20] sm:$0xf] }
  0x4d   : > { %2472 = vmatprep.mubr.msk.bf16.mxu0 %vm322_vm1, %v2652_v24  ;;  %v1491_v59 = vrot.slane %v1489_v51, 5  ;;  %v1472_v62 = vor.u32 %v1471_v53, %v1468_v52  ;;  %v2257_v63 = vld [vmem:[%s2931_s28 + $0x24] sm:$0x1]  ;;  %v1494_v0 = vshrl.u32 %v2254_v56, 16  ;;  %v1497_v1 = vshll.u32 %v2254_v56, 16 }
  0x4e   : > { %v634_v13 = vsel %vm2977_vm4, %v629_v31, %v633_v28  ;;  %v1503_v2 = vshll.u32 %v2255_v60, 16  ;;  %v1486_v3 = vor.u32 %v1485_v58, %v1482_v55  ;;  %v1508_v4 = vshrl.u32 %v2256_v61, 16  ;;  %v2657_v16 = vld [vmem:[%s2931_s28 + $0xc0] ss:$8 sps:$4 sm:$0xff]   ;;  %v2259_v20 = vld [vmem:[%s2931_s28 + $0x2c] sm:$0x1] }
  0x4f   : > { %v2154_v34 = vcombine.low %v620_v30, %v634_v13  ;;  %v1511_v5 = vshll.u32 %v2256_v61, 16  ;;  %v1517_v6 = vshll.u32 %v2257_v63, 16  ;;  %v1473_v7 = vrot.slane %v1472_v62, 4  ;;  %v2258_v19 = vld [vmem:[%s2931_s28 + $0x28] sm:$0xf] }
  0x50   : > { %v1496_v8 = vrot.slane %v1494_v0, 4  ;;  %v1499_v9 = vrot.slane %v1497_v1, 5  ;;  %v1505_v10 = vrot.slane %v1503_v2, 5  ;;  %v1487_v11 = vrot.slane %v1486_v3, 4  ;;  %v2260_v21 = vld [vmem:[%s2931_s28 + $0x30] sm:$0xf] }
  0x51   : > { %2427 = vmatmul.mubr.msk.bf16.gmra.mrb[4].mxu1 %vm322_vm1, %v2154_v34  ;;  %v1510_v12 = vrot.slane %v1508_v4, 4  ;;  %v1513_v14 = vrot.slane %v1511_v5, 5  ;;  %v1519_v15 = vrot.slane %v1517_v6, 5  ;;  %v1478_v17 = vsel %vm2977_vm4, %v1473_v7, %v1477_v54  ;;  %v2261_v24 = vld [vmem:[%s2931_s28 + $0x34] sm:$0x1] }
  0x52   : > { %2432 = vmatprep.mubr.msk.bf16.mxu1 %vm322_vm1, %v2651_v33  ;;  %v1500_v18 = vor.u32 %v1499_v9, %v1496_v8  ;;  %v1492_v22 = vsel %vm2977_vm4, %v1487_v11, %v1491_v59  ;;  %v1522_v25 = vshrl.u32 %v2258_v19, 16  ;;  %v1525_v26 = vshll.u32 %v2258_v19, 16  ;;  %v2659_v31 = vld [vmem:[%s2931_s28 + $0xd8] ss:$8 sps:$4 sm:$0xff]   ;;  %v2660_v62 = vld [vmem:[%s2931_s28 + $0xe8] ss:$8 sps:$4 sm:$0xff]  }
  0x53   : > { %v1514_v23 = vor.u32 %v1513_v14, %v1510_v12  ;;  %v2266_v27 = vcombine.low %v1478_v17, %v1492_v22  ;;  %v1531_v29 = vshll.u32 %v2259_v20, 16  ;;  %v1536_v30 = vshrl.u32 %v2260_v21, 16  ;;  %v2262_v39 = vld [vmem:[%s2931_s28 + $0x38] sm:$0xf]  ;;  %v2264_v44 = vld [vmem:[%s2931_s28 + $0x40] sm:$0xf] }
  0x54   : > { %2473 = vmatmul.mubr.msk.bf16.vlgmr.msra.gmra.mrb[0].mxu0 %vm322_vm1, %v2654_v35  ;;  %v1501_v28 = vrot.slane %v1500_v18, 4  ;;  %v1524_v13 = vrot.slane %v1522_v25, 4  ;;  %v1527_v33 = vrot.slane %v1525_v26, 5  ;;  %v1539_v34 = vshll.u32 %v2260_v21, 16  ;;  %v2661_v3 = vld [vmem:[%s2931_s28 + $0xf8] ss:$8 sps:$4 sm:$0xff]  }
  0x55   : > { %2481 = vmatpush3.bf16.msra.mxu0 %v1603_v36  ;;  %2476 = vmatprep.mubr.msk.bf16.mxu0 %vm322_vm1, %v2656_v38  ;;  %v1515_v32 = vrot.slane %v1514_v23, 4  ;;  %v1533_v36 = vrot.slane %v1531_v29, 5  ;;  %v1545_v38 = vshll.u32 %v2261_v24, 16  ;;  %v1550_v46 = vshrl.u32 %v2262_v39, 16  ;;  %v2662_v12 = vld [vmem:[%s2931_s28 + $0x108] ss:$8 sps:$4 sm:$0xff]  }
  0x56   : > { %v1506_v35 = vsel %vm2977_vm4, %v1501_v28, %v1505_v10  ;;  %v1528_v41 = vor.u32 %v1527_v33, %v1524_v13  ;;  %v1541_v42 = vrot.slane %v1539_v34, 5  ;;  %v1553_v50 = vshll.u32 %v2262_v39, 16 }
  0x57   : > { %v1520_v40 = vsel %vm2977_vm4, %v1515_v32, %v1519_v15  ;;  %v1547_v48 = vrot.slane %v1545_v38, 5  ;;  %v1552_v54 = vrot.slane %v1550_v46, 4  ;;  %v1564_v55 = vshrl.u32 %v2264_v44, 16 }
  0x58   : > { %v2267_v47 = vcombine.low %v1506_v35, %v1520_v40  ;;  %v1529_v52 = vrot.slane %v1528_v41, 4  ;;  %v1555_v56 = vrot.slane %v1553_v50, 5 }
  0x59   : > { %2433 = vmatmul.mubr.msk.bf16.vlgmr.msra.gmra.mrb[0].mxu1 %vm322_vm1, %v2653_v43  ;;  %v2263_v43 = vld [vmem:[%s2931_s28 + $0x3c] sm:$0x1]  ;;  %v1566_v61 = vrot.slane %v1564_v55, 4 }
  0x5a   : > { %2491 = vmatpush3.bf16.msra.mxu1 %v1772_v37  ;;  %2436 = vmatprep.mubr.msk.bf16.mxu1 %vm322_vm1, %v2655_v49  ;;  %v1538_v37 = vrot.slane %v1536_v30, 4  ;;  %v2265_v49 = vld [vmem:[%s2931_s28 + $0x44] sm:$0x1]  ;;  %v1559_v51 = vshll.u32 %v2263_v43, 16  ;;  %v1534_v59 = vsel %vm2977_vm4, %v1529_v52, %v1533_v36  ;;  %v1556_v63 = vor.u32 %v1555_v56, %v1552_v54  ;;  %s2121_s28 = sshll.u32 %s3142_s20, 5 }
  0x5b   : > { %v1573_v58 = vshll.u32 %v2265_v49, 16  ;;  %s3145_s29 = scalar_lea.vmem [#allocation2], %s2121_s28  ;;  %s3149_s9 = scalar_lea.vmem [#allocation4], %s2121_s28 }
  0x5c   : > { %2477 = vmatmul.mubr.msk.bf16.gmra.mrb[4].mxu0 %vm322_vm1, %v2658_v57  ;;  %v1542_v53 = vor.u32 %v1541_v42, %v1538_v37  ;;  %v1567_v57 = vshll.u32 %v2264_v44, 16  ;;  %v1561_v0 = vrot.slane %v1559_v51, 5  ;;  %v1557_v5 = vrot.slane %v1556_v63, 4  ;;  %s1936_s10 = sshll.u32 %s3149_s9, 4  ;;  %s1920_s11 = sshll.u32 %s3145_s29, 4  ;;  %s3157_s10 = int_to_ptr.vmem [resolvable:$true] %s1936_s10  ;;  %s3170_s11 = int_to_ptr.vmem [resolvable:$true] %s1920_s11 }
  0x5d   : > { %2482 = vmatprep.mubr.msk.bf16.mxu0 %vm322_vm1, %v2266_v27  ;;  %v1575_v7 = vrot.slane %v1573_v58, 5  ;;  %s1892_s28 = scalar_lea.sflag [#allocation3], %s3142_s20  ;;  %s2663_s14 = scalar_lea.vmem %s3170_s11, 512 }
  0x5e   : > { %v1543_v60 = vrot.slane %v1542_v53, 4  ;;  %v1569_v1 = vrot.slane %v1567_v57, 5  ;;  %v1562_v8 = vsel %vm2977_vm4, %v1557_v5, %v1561_v0  ;;  %p2664_p11 = scmp.ne.s32.totalorder %s3170_s11, %s2663_s14  ;;  %p2670_p0 = scmp.lt.s32.totalorder %s3170_s11, %s2668_s15 }
  0x5f   : > { %p2671_p1 = scmp.lt.s32.totalorder %s2669_s17, %s2663_s14 }
  0x60   : > { %v1548_v2 = vsel %vm2977_vm4, %v1543_v60, %v1547_v48  ;;  %v1570_v6 = vor.u32 %v1569_v1, %v1566_v61  ;;  %p2665_p12 = pnand %p2664_p11, %p2900_p5 }
  0x61   : > { %2437 = vmatmul.mubr.msk.bf16.gmra.mrb[4].mxu1 %vm322_vm1, %v2657_v16  ;;  %v2268_v4 = vcombine.low %v1534_v59, %v1548_v2  ;;  %p2672_p2 = por %p2671_p1, %p2670_p0 }
  0x62   : > { %2492 = vmatprep.mubr.msk.bf16.mxu1 %vm322_vm1, %v2659_v31  ;;  %v1571_v9 = vrot.slane %v1570_v6, 4  ;;  %p2666_p13 = pneg %p2665_p12 }
  0x64   : > { %2483 = vmatmul.mubr.msk.bf16.vlgmr.msra.gmra.mrb[0].mxu0 %vm322_vm1, %v2267_v47  ;;  %v1576_v10 = vsel %vm2977_vm4, %v1571_v9, %v1575_v7  ;;  %p2673_p3 = pnand %p2672_p2, %p2666_p13 }
  0x65   : > { %2486 = vmatprep.mubr.msk.bf16.mxu0 %vm322_vm1, %v2268_v4  ;;  %v2269_v11 = vcombine.low %v1562_v8, %v1576_v10 }
  0x69   : > { %2493 = vmatmul.mubr.msk.bf16.vlgmr.msra.gmra.mrb[8].mxu1 %vm322_vm1, %v2660_v62 }
  0x6a   : > { %2496 = vmatprep.mubr.msk.bf16.mxu1 %vm322_vm1, %v2661_v3 }
  0x6c   : > { %2487 = vmatmul.mubr.msk.bf16.gmra.mrb[4].mxu0 %vm322_vm1, %v2269_v11 }
  0x71   : > { %2497 = vmatmul.mubr.msk.bf16.gmra.mrb[12].mxu1 %vm322_vm1, %v2662_v12 }
 0x12c   : > { %v2434_v14 = vpop.f32.mrb[0].mxu1 }
 0x12d   : > { %v819_v15 = vpop.f32.mrb[1].mxu1 }
 0x12e   : > { %v2435_v16 = vpop.f32.mrb[2].mxu1 }
 0x12f   : > { %v822_v17 = vpop.f32.mrb[3].mxu1 }
 0x134   : > { %v2438_v18 = vpop.f32.mrb[4].mxu1 }
 0x135   : > { %v835_v19 = vpop.f32.mrb[5].mxu1 }
 0x136   : > { %v2439_v20 = vpop.f32.mrb[6].mxu1 }
 0x137   : > { %v838_v21 = vpop.f32.mrb[7].mxu1  ;;  %v2484_v22 = vpop.f32.mrb[0].mxu0 }
 0x138   : > { %v2500_v45 = vadd.f32 %v2484_v22, %v2434_v14  ;;  %v1639_v23 = vpop.f32.mrb[1].mxu0 }
 0x139   : > { %v2501_v24 = vadd.f32 %v1639_v23, %v819_v15  ;;  %v2485_v25 = vpop.f32.mrb[2].mxu0 }
 0x13a   : > { %v2502_v26 = vadd.f32 %v2485_v25, %v2435_v16  ;;  %v1642_v27 = vpop.f32.mrb[3].mxu0  ;;  %v1694_v37 = vmul.f32 %v2500_v45, %v2500_v45 }
 0x13b   : > { %v2503_v28 = vadd.f32 %v1642_v27, %v822_v17  ;;  %v1692_v31 = vmul.f32 %v2501_v24, %v2501_v24 }
 0x13c   : > { %v2494_v29 = vpop.f32.mrb[8].mxu1  ;;  %v2312_v30 = vpack.c.bf16 %v2502_v26, %v2500_v45  ;;  %v1695_v46 = vmul.f32 %v2502_v26, %v2502_v26 }
 0x13d   : > { %v1808_v32 = vpop.f32.mrb[9].mxu1  ;;  %v1678_v13 = vadd.f32 %v2503_v28, %v2501_v24  ;;  %v1693_v33 = vmul.f32 %v2503_v28, %v2503_v28  ;;  %v2307_v34 = vpack.c.bf16 %v2503_v28, %v2501_v24  ;;  %v1855_v50 = vmul.f32 %v2494_v29, %v2494_v29 }
 0x13e   : > { %v1853_v35 = vmul.f32 %v1808_v32, %v1808_v32  ;;  %2344 = vst [vmem:[%s3145_s29 + $0x8] sm:$0xff] %v2312_v30   ;;  %v2495_v36 = vpop.f32.mrb[10].mxu1 }
 0x13f   : > { %v2332_v38 = vpack.c.bf16 %v2495_v36, %v2494_v29  ;;  %v1679_v39 = vadd.f32 %v2500_v45, %v1678_v13  ;;  %v1700_v40 = vadd.f32 %v1693_v33, %v1692_v31  ;;  %2308 = vst [vmem:[%s3145_s29] sm:$0xff] %v2307_v34   ;;  %v1811_v41 = vpop.f32.mrb[11].mxu1  ;;  %v2488_v48 = vpop.f32.mrb[4].mxu0  ;;  %v1856_v58 = vmul.f32 %v2495_v36, %v2495_v36 }
 0x140   : > { %v1839_v42 = vadd.f32 %v1811_v41, %v1808_v32  ;;  %v1854_v43 = vmul.f32 %v1811_v41, %v1811_v41  ;;  %v2327_v44 = vpack.c.bf16 %v1811_v41, %v1808_v32  ;;  %v2504_v53 = vadd.f32 %v2488_v48, %v2438_v18  ;;  %v1655_v54 = vpop.f32.mrb[5].mxu0 }
 0x141   : > { %2347 = vst [vmem:[%s3149_s9 + $0x8] sm:$0xff] %v2332_v38   ;;  %v1701_v47 = vadd.f32 %v1700_v40, %v1694_v37  ;;  %v1680_v49 = vadd.f32 %v2502_v26, %v1679_v39  ;;  %v2505_v55 = vadd.f32 %v1655_v54, %v835_v19  ;;  %v2489_v57 = vpop.f32.mrb[6].mxu0 }
 0x142   : > { %v1840_v51 = vadd.f32 %v2494_v29, %v1839_v42  ;;  %v1861_v52 = vadd.f32 %v1854_v43, %v1853_v35  ;;  %2328 = vst [vmem:[%s3149_s9] sm:$0xff] %v2327_v44   ;;  %v3155_v62 = vadd.f32 %v2489_v57, %v2439_v20  ;;  %v1658_v63 = vpop.f32.mrb[7].mxu0  ;;  %v1698_v20 = vmul.f32 %v2504_v53, %v2504_v53 }
 0x143   : > { %v1702_v56 = vadd.f32 %v1701_v47, %v1695_v46  ;;  %v1681_v0 = vadd.f32 %v2505_v55, %v1680_v49  ;;  %v1696_v1 = vmul.f32 %v2505_v55, %v2505_v55  ;;  %v2507_v3 = vadd.f32 %v1658_v63, %v838_v21 }
 0x144   : > { %v1862_v59 = vadd.f32 %v1861_v52, %v1855_v50  ;;  %v2498_v60 = vpop.f32.mrb[12].mxu1  ;;  %v1841_v61 = vadd.f32 %v2495_v36, %v1840_v51  ;;  %v2322_v9 = vpack.c.bf16 %v3155_v62, %v2504_v53 }
 0x145   : > { %v1824_v2 = vpop.f32.mrb[13].mxu1  ;;  %v1703_v8 = vadd.f32 %v1702_v56, %v1696_v1  ;;  %v1682_v14 = vadd.f32 %v2507_v3, %v1681_v0  ;;  %v1697_v15 = vmul.f32 %v2507_v3, %v2507_v3  ;;  %v2317_v16 = vpack.c.bf16 %v2507_v3, %v2505_v55 }
 0x146   : > { %v1842_v4 = vadd.f32 %v1841_v61, %v1824_v2  ;;  %v1857_v5 = vmul.f32 %v1824_v2, %v1824_v2  ;;  %v1863_v6 = vadd.f32 %v1862_v59, %v1856_v58  ;;  %v3160_v7 = vpop.f32.mrb[14].mxu1  ;;  %2346 = vst [vmem:[%s3145_s29 + $0x18] sm:$0xff] %v2322_v9   ;;  %v3180_v45 = vmul.f32 %v2498_v60, %v2498_v60 }
 0x147   : > { %v2342_v10 = vpack.c.bf16 %v3160_v7, %v2498_v60  ;;  %v1827_v11 = vpop.f32.mrb[15].mxu1  ;;  %v1683_v21 = vadd.f32 %v2504_v53, %v1682_v14  ;;  %v1704_v22 = vadd.f32 %v1703_v8, %v1697_v15  ;;  %2345 = vst [vmem:[%s3145_s29 + $0x10] sm:$0xff] %v2317_v16  }
 0x148   : > { %v1864_v12 = vadd.f32 %v1863_v6, %v1857_v5  ;;  %v1843_v17 = vadd.f32 %v1842_v4, %v1827_v11  ;;  %v1858_v18 = vmul.f32 %v1827_v11, %v1827_v11  ;;  %v2337_v19 = vpack.c.bf16 %v1827_v11, %v1824_v2 }
 0x149   : > { %2349 = vst [vmem:[%s3149_s9 + $0x18] sm:$0xff] %v2342_v10  }
 0x14a   : > { %v3182_v23 = vadd.f32 %v2498_v60, %v1843_v17  ;;  %v3184_v24 = vadd.f32 %v1864_v12, %v1858_v18  ;;  %2348 = vst [vmem:[%s3149_s9 + $0x10] sm:$0xff] %v2337_v19  }
 0x14b   : > { %2676 = shalt.err (!%p2673_p3)
}
 0x14c   : > { %s2677_s29 = scalar_lea.hbm %s3168_s16, 512  ;;  %s2681_s12 = scalar_lea.hbm %s3339_s3, 1024 }
 0x14d   : > { %p2678_p4 = scmp.ne.s32.totalorder %s3168_s16, %s2677_s29  ;;  %p2682_p9 = scmp.lt.u32.totalorder %s3168_s16, %s3339_s3 }
 0x14e   : > { %p2683_p10 = scmp.lt.u32.totalorder %s2681_s12, %s2677_s29  ;;  %p2685_p12 = scmp.lt.u32.totalorder %s2677_s29, %s3168_s16 }
 0x14f   : > { %p2679_p7 = pnand %p2678_p4, %p2900_p5 }
 0x150   : > { %p2684_p11 = por %p2683_p10, %p2682_p9 }
 0x151   : > { %p2680_p8 = pneg %p2679_p7 }
 0x152   : > { %p2686_p13 = por %p2685_p12, %p2684_p11 }
 0x154   : > { %p2687_p0 = pnand %p2686_p13, %p2680_p8 }
 0x156   : > { %2690 = shalt.err (!%p2687_p0)
}
 0x157   : > { %s2820_s14 = smov 64   ;;  %s2821_s17 = smov 4   ;;  %v1699_v25 = vmul.f32 %v3155_v62, %v3155_v62  ;;  %v1684_v26 = vadd.f32 %v3155_v62, %v1683_v21  ;;  %v1705_v27 = vadd.f32 %v1704_v22, %v1698_v20 }
 0x158   : > { %2575 = dma.vmem_to_hbm [thread:$0]  (%p2900_p5), %s3170_s11, 512, %s3168_s16, %s1892_s28, %s2820_s14, %s2820_s14, %s2821_s17  }
 0x159   : > { %s3219_s26 = scalar_lea.sflag [#allocation5], %s1896_s13  ;;  %s2691_s29 = scalar_lea.vmem %s3157_s10, 512 }
 0x15a   : > { %p2692_p1 = scmp.ne.s32.totalorder %s3157_s10, %s2691_s29  ;;  %s2822_s9 = smov [#allocation4]  }
 0x15b   : > { %s2695_s18 = sshll.u32 %s2822_s9, 4  ;;  %s2696_s18 = int_to_ptr.vmem [resolvable:$false] %s2695_s18 }
 0x15c   : > { %p2693_p2 = pnand %p2692_p1, %p2900_p5  ;;  %s2697_s12 = scalar_lea.vmem %s2696_s18, 1024 }
 0x15d   : > { %p2698_p4 = scmp.lt.s32.totalorder %s3157_s10, %s2696_s18  ;;  %p2699_p7 = scmp.lt.s32.totalorder %s2697_s12, %s2691_s29 }
 0x15e   : > { %p2694_p3 = pneg %p2693_p2 }
 0x15f   : > { %p2700_p8 = por %p2699_p7, %p2698_p4 }
 0x161   : > { %p2701_p9 = pnand %p2700_p8, %p2694_p3 }
 0x163   : > { %2704 = shalt.err (!%p2701_p9)
}
 0x164   : > { %s2705_s11 = scalar_lea.hbm %s3177_s19, 512  ;;  %s2709_s28 = scalar_lea.hbm %s3340_s4, 1024 }
 0x165   : > { %p2706_p10 = scmp.ne.s32.totalorder %s3177_s19, %s2705_s11  ;;  %p2710_p13 = scmp.lt.u32.totalorder %s3177_s19, %s3340_s4 }
 0x166   : > { %p2711_p0 = scmp.lt.u32.totalorder %s2709_s28, %s2705_s11  ;;  %p2713_p2 = scmp.lt.u32.totalorder %s2705_s11, %s3177_s19 }
 0x167   : > { %p2707_p11 = pnand %p2706_p10, %p2900_p5 }
 0x168   : > { %p2712_p1 = por %p2711_p0, %p2710_p13 }
 0x169   : > { %p2708_p12 = pneg %p2707_p11 }
 0x16a   : > { %p2714_p3 = por %p2713_p2, %p2712_p1 }
 0x16c   : > { %p2715_p4 = pnand %p2714_p3, %p2708_p12 }
 0x16e   : > { %2718 = shalt.err (!%p2715_p4)
}
 0x16f   : > { %2576 = dma.vmem_to_hbm [thread:$0]  (%p2900_p5), %s3157_s10, 512, %s3177_s19, %s3219_s26, %s2820_s14, %s2820_s14, %s2821_s17   ;;  %v1860_v28 = vmul.f32 %v3160_v7, %v3160_v7  ;;  %v1845_v29 = vadd.f32 %v3160_v7, %v3182_v23  ;;  %v1866_v30 = vadd.f32 %v3184_v24, %v3180_v45  ;;  %v1685_v31 = vrot.slane %v1684_v26, 4 }
 0x170   : > { %v1706_v32 = vadd.f32 %v1705_v27, %v1699_v25  ;;  %s2123_s10 = sshll.u32 %s3142_s20, 1  ;;  %s2298_s19 = sshll.u32 %s2881_s25, 5 }
 0x171   : > { %v1846_v13 = vrot.slane %v1845_v29, 4  ;;  %v1867_v33 = vadd.f32 %v1866_v30, %v1860_v28  ;;  %v1686_v34 = vadd.f32 %v1685_v31, %v1684_v26  ;;  %s265_s14 = scalar_lea.vmem [#allocation6], %s2123_s10  ;;  %s3254_s29 = scalar_lea.vmem [#allocation7], %s2123_s10 }
 0x172   : > { %v1707_v35 = vrot.slane %v1706_v32, 4  ;;  %s1952_s17 = sshll.u32 %s265_s14, 4  ;;  %s1965_s18 = sshll.u32 %s3254_s29, 4  ;;  %s3262_s17 = int_to_ptr.vmem [resolvable:$true] %s1952_s17  ;;  %s3270_s18 = int_to_ptr.vmem [resolvable:$true] %s1965_s18 }
 0x173   : > { %v1847_v36 = vadd.f32 %v1846_v13, %v1845_v29  ;;  %v1868_v37 = vrot.slane %v1867_v33, 4  ;;  %v1687_v38 = vrot.slane %v1686_v34, 2  ;;  %s3260_s13 = scalar_lea.hbm %s3341_s5, %s2298_s19  ;;  %s3268_s28 = scalar_lea.hbm %s3342_s6, %s2298_s19 }
 0x174   : > { %v1708_v39 = vadd.f32 %v1707_v35, %v1706_v32  ;;  %s2719_s15 = scalar_lea.vmem %s3262_s17, 32  ;;  %s2823_s9 = smov [#allocation6]  }
 0x175   : > { %v1848_v40 = vrot.slane %v1847_v36, 2  ;;  %v1869_v41 = vadd.f32 %v1868_v37, %v1867_v33  ;;  %v1688_v42 = vadd.f32 %v1687_v38, %v1686_v34  ;;  %p2720_p7 = scmp.ne.s32.totalorder %s3262_s17, %s2719_s15  ;;  %s2723_s10 = sshll.u32 %s2823_s9, 4  ;;  %s2724_s10 = int_to_ptr.vmem [resolvable:$false] %s2723_s10 }
 0x176   : > { %v1709_v43 = vrot.slane %v1708_v39, 2  ;;  %s2725_s12 = scalar_lea.vmem %s2724_s10, 64  ;;  %p2726_p10 = scmp.lt.s32.totalorder %s3262_s17, %s2724_s10 }
 0x177   : > { %v1849_v44 = vadd.f32 %v1848_v40, %v1847_v36  ;;  %v1870_v46 = vrot.slane %v1869_v41, 2  ;;  %v1689_v47 = vrot.slane %v1688_v42, 1  ;;  %p2721_p8 = pnand %p2720_p7, %p2900_p5  ;;  %p2727_p11 = scmp.lt.s32.totalorder %s2725_s12, %s2719_s15 }
 0x178   : > { %v1710_v48 = vadd.f32 %v1709_v43, %v1708_v39 }
 0x179   : > { %v1850_v49 = vrot.slane %v1849_v44, 1  ;;  %v1871_v50 = vadd.f32 %v1870_v46, %v1869_v41  ;;  %v1690_v51 = vadd.f32 %v1689_v47, %v1688_v42  ;;  %p2722_p9 = pneg %p2721_p8  ;;  %p2728_p12 = por %p2727_p11, %p2726_p10 }
 0x17a   : > { %v1711_v52 = vrot.slane %v1710_v48, 1 }
 0x17b   : > { %v1851_v53 = vadd.f32 %v1850_v49, %v1849_v44  ;;  %v1872_v54 = vrot.slane %v1871_v50, 1  ;;  %1691 = vst [vmem:[%s265_s14] sm:$0x1] %v1690_v51  ;;  %p2729_p13 = pnand %p2728_p12, %p2722_p9 }
 0x17c   : > { %v1712_v55 = vadd.f32 %v1711_v52, %v1710_v48 }
 0x17d   : > { %1852 = vst [vmem:[%s3254_s29] sm:$0x1] %v1851_v53  ;;  %v1873_v56 = vadd.f32 %v1872_v54, %v1871_v50 }
 0x17e   : > { %1713 = vst [vmem:[%s265_s14 + $0x1] sm:$0x1] %v1712_v55 }
 0x17f   : > { %2732 = shalt.err (!%p2729_p13)
}
 0x180   : > { %s2733_s19 = scalar_lea.hbm %s3260_s13, 32  ;;  %s2737_s25 = scalar_lea.hbm %s3341_s5, 64 }
 0x181   : > { %p2734_p0 = scmp.ne.s32.totalorder %s3260_s13, %s2733_s19  ;;  %p2738_p3 = scmp.lt.u32.totalorder %s3260_s13, %s3341_s5 }
 0x182   : > { %p2739_p4 = scmp.lt.u32.totalorder %s2737_s25, %s2733_s19  ;;  %p2741_p8 = scmp.lt.u32.totalorder %s2733_s19, %s3260_s13 }
 0x183   : > { %p2735_p1 = pnand %p2734_p0, %p2900_p5 }
 0x184   : > { %p2740_p7 = por %p2739_p4, %p2738_p3 }
 0x185   : > { %p2736_p2 = pneg %p2735_p1 }
 0x186   : > { %p2742_p9 = por %p2741_p8, %p2740_p7 }
 0x188   : > { %p2743_p10 = pnand %p2742_p9, %p2736_p2 }
 0x18a   : > { %2746 = shalt.err (!%p2743_p10)
}
 0x18b   : > { %2577 = dma.vmem_to_hbm [thread:$0]  (%p2900_p5), %s3262_s17, 32, %s3260_s13, %s3219_s26   ;;  %1874 = vst [vmem:[%s3254_s29 + $0x1] sm:$0x1] %v1873_v56 }
 0x18c   : > { %s1907_s15 = scalar_lea.sflag [#allocation8], %s3142_s20  ;;  %s2747_s10 = scalar_lea.vmem %s3270_s18, 32 }
 0x18d   : > { %p2748_p11 = scmp.ne.s32.totalorder %s3270_s18, %s2747_s10  ;;  %s2824_s12 = smov [#allocation7]  }
 0x18e   : > { %s2751_s19 = sshll.u32 %s2824_s12, 4  ;;  %s2752_s19 = int_to_ptr.vmem [resolvable:$false] %s2751_s19 }
 0x18f   : > { %p2749_p12 = pnand %p2748_p11, %p2900_p5  ;;  %s2753_s14 = scalar_lea.vmem %s2752_s19, 64 }
 0x190   : > { %p2754_p0 = scmp.lt.s32.totalorder %s3270_s18, %s2752_s19  ;;  %p2755_p1 = scmp.lt.s32.totalorder %s2753_s14, %s2747_s10 }
 0x191   : > { %p2750_p13 = pneg %p2749_p12 }
 0x192   : > { %p2756_p2 = por %p2755_p1, %p2754_p0 }
 0x194   : > { %p2757_p3 = pnand %p2756_p2, %p2750_p13 }
 0x196   : > { %2760 = shalt.err (!%p2757_p3)
}
 0x197   : > { %s2761_s20 = scalar_lea.hbm %s3268_s28, 32  ;;  %s2765_s29 = scalar_lea.hbm %s3342_s6, 64 }
 0x198   : > { %p2762_p4 = scmp.ne.s32.totalorder %s3268_s28, %s2761_s20  ;;  %p2766_p9 = scmp.lt.u32.totalorder %s3268_s28, %s3342_s6 }
 0x199   : > { %p2767_p10 = scmp.lt.u32.totalorder %s2765_s29, %s2761_s20  ;;  %p2769_p12 = scmp.lt.u32.totalorder %s2761_s20, %s3268_s28 }
 0x19a   : > { %p2763_p7 = pnand %p2762_p4, %p2900_p5 }
 0x19b   : > { %p2768_p11 = por %p2767_p10, %p2766_p9 }
 0x19c   : > { %p2764_p8 = pneg %p2763_p7 }
 0x19d   : > { %p2770_p13 = por %p2769_p12, %p2768_p11 }
 0x19f   : > { %p2771_p0 = pnand %p2770_p13, %p2764_p8 }
 0x1a1   : > { %2774 = shalt.err (!%p2771_p0)
}
 0x1a2   : > { %2578 = dma.vmem_to_hbm [thread:$0]  (%p2900_p5), %s3270_s18, 32, %s3268_s28, %s1907_s15  }
 0x1a3 PF: > { %p2596_p1 = scmp.ge.s32.totalorder %s2817_s24, 2  ;;  %s1977_s25 = sand.u32 1, %s2805_s21  }
 0x1a4   : > { %s1978_s16 = scalar_lea.sflag [#allocation3], %s1977_s25 }
 0x1a5   : > { %p2584_p2 = pnand %p2596_p1, %p2904_p6 }
 0x1a7   : > { %2792 = dma.done.wait (!%p2584_p2), %s1978_s16, 512  }
 0x1a8   : > { %2794 = vsyncadd (!%p2584_p2), %s1978_s16, 4294966784  ;;  %s3348_s9 = sadd.s32 4294967294, %s2817_s24  }
 0x1a9   : > { %s1986_s10 = sand.u32 1, %s3348_s9  }
 0x1aa   : > { %s1987_s12 = scalar_lea.sflag [#allocation5], %s1986_s10 }
 0x1ab   : > { %2796 = dma.done.wait (!%p2584_p2), %s1987_s12, 544  }
 0x1ac   : > { %2798 = vsyncadd (!%p2584_p2), %s1987_s12, 4294966752  ;;  %s2005_s7 = scalar_lea.sflag [#allocation8], %s1977_s25 }
 0x1ad   : > { %2800 = dma.done.wait (!%p2584_p2), %s2005_s7, 32  }
 0x1ae   : > { %2802 = vsyncadd (!%p2584_p2), %s2005_s7, 4294967264  ;;  %p23_p5 = scmp.ge.s32.totalorder %s2885_s27, 4   ;;  %s3349_s21 = smov %s2809_s22 }
 0x1af   : > { %s3350_s22 = smov %s2813_s23  ;;  %s3351_s23 = smov %s2898_s30 }
 0x1b0   : > { %s3352_s24 = smov %s2885_s27  ;;  %25 = sbr.rel (!%p23_p5) target bundleno = 7 (0x7), region = 121 }
 0x1b7   :  { %2010 = vsyncpa [#allocation3], 1 }
 0x1b8   :  { %2012 = vsyncpa [#allocation3 + $0x1], 1 }
 0x1b9   :  { %2013 = vsyncpa [#allocation5], 1 }
 0x1ba   :  { %2015 = vsyncpa [#allocation5 + $0x1], 1 }
 0x1bb   :  { %2016 = vsyncpa [#allocation8], 1 }
 0x1bc   :  { %2018 = vsyncpa [#allocation8 + $0x1], 1 }

</bundles_post_ra>
